<compile_context>
chip_gen: v6e
topology: v6e:2x2x1
jax: 0.10.0
libtpu: 0.0.40
codegen_flags: <defaults>
</compile_context>

<pallas_src>
import functools

import jax
import jax.numpy as jnp
from jax import lax
from jax.experimental import pallas as pl
from jax.experimental.pallas import tpu as pltpu


# ----------------------------- conv as matmul ------------------------------
def _conv_mm_kernel(p_ref, w_ref, b_ref, o_ref, *, activation):
    p = p_ref[...]                                   # (K, TP)   K = Cin*kh*kw
    w = w_ref[...]                                   # (Cout, K)
    b = b_ref[...]                                   # (Cout, 1)
    y = jnp.dot(w, p, preferred_element_type=jnp.float32) + b
    if activation == "relu":
        y = jnp.maximum(y, 0.0)
    elif activation == "tanh":
        y = jnp.tanh(y)
    o_ref[...] = y.astype(o_ref.dtype)


def _lane_tile(p_total, cap=2048):
    """Largest multiple-of-128 divisor of p_total (capped); prefer >=2 steps."""
    if p_total % 128 != 0:
        return p_total                       # small: full-array block
    tile = 128
    d = (min(p_total, cap) // 128) * 128
    while d >= 128:
        if p_total % d == 0:
            tile = d
            break
        d -= 128
    if tile == p_total and (p_total // 2) % 128 == 0:
        tile = p_total // 2                  # give both v7x TensorCores work
    return tile


def conv2d_pallas(x, w, b, *, stride=1, padding=1, activation=None,
                  pre_scale=1.0, lane_cap=2048):
    """3x3 conv (NCHW / OIHW) as a single fused matmul kernel.

    Patches are (K, N*Ho*Wo): batch folded into the lane axis -> lane-dense
    output stores and one big MXU matmul instead of a per-batch grid.
    """
    N, Cin, H, W = x.shape
    Cout, _, kh, kw = w.shape
    Ho = (H + 2 * padding - kh) // stride + 1
    Wo = (W + 2 * padding - kw) // stride + 1
    K = Cin * kh * kw
    P = N * Ho * Wo

    # TODO(synk): im2col stays wrapper-side (tiny tensors here); at large
    # resolutions move the 9 shifted-slice matmuls into the kernel to avoid
    # the 9x patch-tensor HBM traffic.
    xp = jnp.pad(x, ((0, 0), (0, 0), (padding, padding), (padding, padding)))
    cols = []
    for di in range(kh):
        for dj in range(kw):
            cols.append(xp[:, :, di:di + stride * Ho:stride,
                              dj:dj + stride * Wo:stride])
    # (9, N, Cin, Ho, Wo) -> (Cin, 9, N, Ho, Wo) -> (K, N*Ho*Wo); feature
    # ordering (cin, kh, kw) matches w.reshape(Cout, Cin*kh*kw).
    patches = jnp.stack(cols, axis=0).transpose(2, 0, 1, 3, 4).reshape(K, P)

    # pre_scale folds "conv(x + x)" into the weights: W @ (2x) == (2W) @ x.
    w2 = (w.reshape(Cout, K) * jnp.asarray(pre_scale, w.dtype)).astype(x.dtype)
    b2 = b.reshape(Cout, 1).astype(x.dtype)

    TP = _lane_tile(P, lane_cap)
    grid = (P // TP,)

    kernel = functools.partial(_conv_mm_kernel, activation=activation)
    out = pl.pallas_call(
        kernel,
        out_shape=jax.ShapeDtypeStruct((Cout, P), x.dtype),
        grid_spec=pltpu.PrefetchScalarGridSpec(
            num_scalar_prefetch=0,
            grid=grid,
            in_specs=[
                pl.BlockSpec((K, TP), lambda i: (0, i)),
                pl.BlockSpec((Cout, K), lambda i: (0, 0)),
                pl.BlockSpec((Cout, 1), lambda i: (0, 0)),
            ],
            out_specs=pl.BlockSpec((Cout, TP), lambda i: (0, i)),
        ),
        compiler_params=pltpu.CompilerParams(
            dimension_semantics=("parallel",)),
    )(patches, w2, b2)
    return out.reshape(Cout, N, Ho, Wo).transpose(1, 0, 2, 3)


# --------------------------- attention bottleneck ---------------------------
def _mhsa_kernel(x_ref, wqkv_ref, bqkv_ref, wo_ref, bo_ref, o_ref, *,
                 num_heads, head_dim):
    N, S, E = x_ref.shape
    D = head_dim
    scale = 1.0 / (float(D) ** 0.5)

    x = x_ref[...].reshape(N * S, E)                       # (N*S, E)
    # Fused QKV projection: one big MXU matmul for the whole batch.
    qkv = jnp.dot(x, wqkv_ref[...],
                  preferred_element_type=jnp.float32) + bqkv_ref[...]
    qkv = qkv.reshape(N, S, 3 * E)

    heads = []
    for h in range(num_heads):                             # static unroll
        qh = qkv[:, :, h * D:(h + 1) * D]                  # (N, S, D)
        kh = qkv[:, :, E + h * D:E + (h + 1) * D]
        vh = qkv[:, :, 2 * E + h * D:2 * E + (h + 1) * D]
        s = jnp.einsum("bqd,bkd->bqk", qh, kh,
                       preferred_element_type=jnp.float32) * scale
        s = s - jnp.max(s, axis=-1, keepdims=True)
        p = jnp.exp(s)
        p = p * pl.reciprocal(jnp.sum(p, axis=-1, keepdims=True), approx=True)
        heads.append(jnp.einsum("bqk,bkd->bqd", p, vh,
                                preferred_element_type=jnp.float32))

    a = jnp.concatenate(heads, axis=-1).reshape(N * S, E)  # merge heads
    # Single fused output projection.
    y = jnp.dot(a, wo_ref[...],
                preferred_element_type=jnp.float32) + bo_ref[...]
    o_ref[...] = y.reshape(N, S, E).astype(o_ref.dtype)


def mhsa_pallas(x4, wq, bq, wk, bk, wv, bv, wo, bo, *, num_heads=4):
    N, C, H, W = x4.shape
    S, E = H * W, C
    D = E // num_heads

    # Mirrors torch: x.reshape(batch, H*W, -1)  (raw row-major reshape).
    tokens = x4.reshape(N, S, E)

    # torch Linear: y = x @ W.T + b.  Pack Q/K/V into one (E, 3E) weight and
    # one (1, 3E) bias -> 5 kernel inputs instead of 9.
    wqkv = jnp.concatenate([wq.T, wk.T, wv.T], axis=1).astype(x4.dtype)
    bqkv = jnp.concatenate([bq, bk, bv]).reshape(1, 3 * E).astype(x4.dtype)
    woT = wo.T.astype(x4.dtype)
    bo2 = bo.reshape(1, E).astype(x4.dtype)

    kernel = functools.partial(_mhsa_kernel, num_heads=num_heads, head_dim=D)
    out = pl.pallas_call(
        kernel,
        out_shape=jax.ShapeDtypeStruct((N, S, E), x4.dtype),
        grid_spec=pltpu.PrefetchScalarGridSpec(
            num_scalar_prefetch=0,
            grid=(1,),
            in_specs=[
                pl.BlockSpec((N, S, E), lambda i: (0, 0, 0)),
                pl.BlockSpec((E, 3 * E), lambda i: (0, 0)),
                pl.BlockSpec((1, 3 * E), lambda i: (0, 0)),
                pl.BlockSpec((E, E), lambda i: (0, 0)),
                pl.BlockSpec((1, E), lambda i: (0, 0)),
            ],
            out_specs=pl.BlockSpec((N, S, E), lambda i: (0, 0, 0)),
        ),
        compiler_params=pltpu.CompilerParams(
            dimension_semantics=("arbitrary",)),
    )(tokens, wqkv, bqkv, woT, bo2)

    # Mirrors torch: reshape(batch, H, W, E).permute(0, 3, 1, 2).
    return out.reshape(N, H, W, E).transpose(0, 3, 1, 2)


# ------------------------------ full forward --------------------------------
def _upsample2x(t):
    # Nearest-neighbor 2x upsample: pure relayout, left to XLA to fuse with
    # the adjacent residual add.
    return jnp.repeat(jnp.repeat(t, 2, axis=-2), 2, axis=-1)


def denoiser_forward(x, p):
    x1 = conv2d_pallas(x,  p["w1"], p["b1"], stride=1, activation="relu")
    x2 = conv2d_pallas(x1, p["w2"], p["b2"], stride=2, activation="relu")
    x3 = conv2d_pallas(x2, p["w3"], p["b3"], stride=2, activation="relu")
    x4 = conv2d_pallas(x3, p["w4"], p["b4"], stride=2, activation="relu")

    xb = mhsa_pallas(x4, p["wq"], p["bq"], p["wk"], p["bk"],
                     p["wv"], p["bv"], p["wo"], p["bo"], num_heads=4)

    # Residual adds + upsampling as plain jnp (XLA fuses them; standalone
    # pallas elementwise kernels here are pure overhead).
    u = _upsample2x(xb)
    u = _upsample2x(u + x3)
    u = _upsample2x(u + x2)
    u = u + x1

    r = conv2d_pallas(u, p["wr"], p["br"], stride=1, activation=None)
    # output_layer(x + x) followed by tanh; the doubling is folded into the
    # weights via pre_scale=2.
    return conv2d_pallas(r, p["wout"], p["bout"], stride=1,
                         activation="tanh", pre_scale=2.0)


# -------------------------- pure-JAX reference -------------------------------
def _ref_conv(x, w, b, stride):
    y = lax.conv_general_dilated(
        x, w, window_strides=(stride, stride), padding=((1, 1), (1, 1)),
        dimension_numbers=("NCHW", "OIHW", "NCHW"),
        precision=lax.Precision.HIGHEST)
    return y + b.reshape(1, -1, 1, 1)


def _ref_mhsa(x4, p, num_heads=4):
    N, C, H, W = x4.shape
    t = x4.reshape(N, H * W, -1)

    def lin(u, w, b):
        return jnp.einsum("nse,oe->nso", u, w,
                          precision=lax.Precision.HIGHEST) + b

    q = lin(t, p["wq"], p["bq"])
    k = lin(t, p["wk"], p["bk"])
    v = lin(t, p["wv"], p["bv"])
    D = C // num_heads
    split = lambda u: u.reshape(N, -1, num_heads, D).transpose(0, 2, 1, 3)
    qh, kh, vh = split(q), split(k), split(v)
    s = jnp.einsum("nhqd,nhkd->nhqk", qh, kh,
                   precision=lax.Precision.HIGHEST) / (D ** 0.5)
    a = jax.nn.softmax(s, axis=-1)
    o = jnp.einsum("nhqk,nhkd->nhqd", a, vh, precision=lax.Precision.HIGHEST)
    o = o.transpose(0, 2, 1, 3).reshape(N, -1, C)
    o = lin(o, p["wo"], p["bo"])
    return o.reshape(N, H, W, C).transpose(0, 3, 1, 2)


def denoiser_reference(x, p):
    relu = lambda t: jnp.maximum(t, 0.0)
    up = lambda t: jnp.repeat(jnp.repeat(t, 2, axis=-2), 2, axis=-1)
    x1 = relu(_ref_conv(x, p["w1"], p["b1"], 1))
    x2 = relu(_ref_conv(x1, p["w2"], p["b2"], 2))
    x3 = relu(_ref_conv(x2, p["w3"], p["b3"], 2))
    x4 = relu(_ref_conv(x3, p["w4"], p["b4"], 2))
    xb = _ref_mhsa(x4, p)
    u = up(xb)
    u = up(u + x3)
    u = up(u + x2)
    u = u + x1
    r = _ref_conv(u, p["wr"], p["br"], 1)
    return jnp.tanh(_ref_conv(r + r, p["wout"], p["bout"], 1))


if __name__ == "__main__":
    key = jax.random.PRNGKey(0)
    ks = list(jax.random.split(key, 24))

    N, Cin, H, W = 2, 1, 16, 16
    NF = 8          # num_filters = embed_size; 4 heads -> head_dim 2

    def rn(k, shape, scale):
        return scale * jax.random.normal(k, shape, dtype=jnp.float32)

    x = jax.random.normal(ks[0], (N, Cin, H, W), dtype=jnp.float32)
    params = {
        "w1": rn(ks[1], (NF, Cin, 3, 3), 0.45),  "b1": rn(ks[2], (NF,), 0.05),
        "w2": rn(ks[3], (NF, NF, 3, 3), 0.16),   "b2": rn(ks[4], (NF,), 0.05),
        "w3": rn(ks[5], (NF, NF, 3, 3), 0.16),   "b3": rn(ks[6], (NF,), 0.05),
        "w4": rn(ks[7], (NF, NF, 3, 3), 0.16),   "b4": rn(ks[8], (NF,), 0.05),
        "wq": rn(ks[9], (NF, NF), 0.35),         "bq": rn(ks[10], (NF,), 0.02),
        "wk": rn(ks[11], (NF, NF), 0.35),        "bk": rn(ks[12], (NF,), 0.02),
        "wv": rn(ks[13], (NF, NF), 0.35),        "bv": rn(ks[14], (NF,), 0.02),
        "wo": rn(ks[15], (NF, NF), 0.35),        "bo": rn(ks[16], (NF,), 0.02),
        "wr": rn(ks[17], (1, NF, 3, 3), 0.16),   "br": rn(ks[18], (1,), 0.05),
        "wout": rn(ks[19], (1, 1, 3, 3), 0.45),  "bout": rn(ks[20], (1,), 0.05),
    }

    fwd = jax.jit(denoiser_forward)
    out = jax.block_until_ready(fwd(x, params))

    ref = jax.block_until_ready(denoiser_reference(x, params))

    assert out.shape == (N, Cin, H, W), out.shape
    max_err = float(jnp.max(jnp.abs(out - ref)))
    assert jnp.allclose(out, ref, atol=2e-3, rtol=2e-3), max_err
    print("KERNEL_OK")
</pallas_src>

<mosaic_0001>
module attributes {stable_mosaic.version = 11 : i64} {
  func.func @_conv_mm_kernel(%arg0: i32, %arg1: memref<9x256xf32, #tpu.memory_space<vmem>>, %arg2: memref<8x9xf32, #tpu.memory_space<vmem>>, %arg3: memref<8x1xf32, #tpu.memory_space<vmem>>, %arg4: memref<8x256xf32, #tpu.memory_space<vmem>>) attributes {dimension_semantics = [#tpu.dimension_semantics<parallel>], iteration_bounds = array<i64: 2>, scalar_prefetch = 0 : i64, scratch_operands = 0 : i64, tpu.core_type = #tpu.core_type<tc>, window_params = [{transform_indices = @transform_0, window_bounds = array<i64: 9, 256>}, {pipeline_mode = #tpu.pipeline_mode<synchronous>, transform_indices = @transform_1, window_bounds = array<i64: 8, 9>}, {pipeline_mode = #tpu.pipeline_mode<synchronous>, transform_indices = @transform_2, window_bounds = array<i64: 8, 1>}, {transform_indices = @transform_3, window_bounds = array<i64: 8, 256>}]} {
    %c0 = arith.constant 0 : index
    %c0_0 = arith.constant 0 : index
    %0 = vector.load %arg1[%c0, %c0_0] : memref<9x256xf32, #tpu.memory_space<vmem>>, vector<9x256xf32>
    %c0_1 = arith.constant 0 : index
    %c0_2 = arith.constant 0 : index
    %1 = vector.load %arg2[%c0_1, %c0_2] : memref<8x9xf32, #tpu.memory_space<vmem>>, vector<8x9xf32>
    %c0_3 = arith.constant 0 : index
    %c0_4 = arith.constant 0 : index
    %2 = vector.load %arg3[%c0_3, %c0_4] : memref<8x1xf32, #tpu.memory_space<vmem>>, vector<8x1xf32>
    %cst = arith.constant dense<0.000000e+00> : vector<8x256xf32>
    %3 = tpu.matmul %1, %0, %cst {dimension_numbers = #tpu.dot_dimension_numbers<[1], [0], [0], [1], [0, 0, 1, 1], [], []>} : vector<8x9xf32>, vector<9x256xf32>, vector<8x256xf32> -> vector<8x256xf32>
    %4 = vector.broadcast %2 : vector<8x1xf32> to vector<8x256xf32>
    %5 = arith.addf %3, %4 : vector<8x256xf32>
    %cst_5 = arith.constant 0.000000e+00 : f32
    %6 = vector.broadcast %cst_5 : f32 to vector<8x256xf32>
    %7 = arith.maximumf %5, %6 : vector<8x256xf32>
    %c0_6 = arith.constant 0 : index
    %c0_7 = arith.constant 0 : index
    %8 = vector.load %arg4[%c0_6, %c0_7] : memref<8x256xf32, #tpu.memory_space<vmem>>, vector<8x256xf32>
    tpu.vector_store %arg4[%c0_6, %c0_7], %7 {strides = array<i32>} : memref<8x256xf32, #tpu.memory_space<vmem>>, vector<8x256xf32>,
    return
  }
  func.func @transform_0(%arg0: i32) -> (i32, i32) {
    %c0_i32 = arith.constant 0 : i32
    %c0_i32_0 = arith.constant 0 : i32
    return %c0_i32, %arg0 : i32, i32
  }
  func.func @transform_1(%arg0: i32) -> (i32, i32) {
    %c0_i32 = arith.constant 0 : i32
    %c0_i32_0 = arith.constant 0 : i32
    %c0_i32_1 = arith.constant 0 : i32
    return %c0_i32, %c0_i32_0 : i32, i32
  }
  func.func @transform_2(%arg0: i32) -> (i32, i32) {
    %c0_i32 = arith.constant 0 : i32
    %c0_i32_0 = arith.constant 0 : i32
    %c0_i32_1 = arith.constant 0 : i32
    return %c0_i32, %c0_i32_0 : i32, i32
  }
  func.func @transform_3(%arg0: i32) -> (i32, i32) {
    %c0_i32 = arith.constant 0 : i32
    %c0_i32_0 = arith.constant 0 : i32
    return %c0_i32, %arg0 : i32, i32
  }
}

module attributes {stable_mosaic.version = 11 : i64} {
  func.func @_conv_mm_kernel(%arg0: i32, %arg1: memref<72x128xf32, #tpu.memory_space<vmem>>, %arg2: memref<8x72xf32, #tpu.memory_space<vmem>>, %arg3: memref<8x1xf32, #tpu.memory_space<vmem>>, %arg4: memref<8x128xf32, #tpu.memory_space<vmem>>) attributes {dimension_semantics = [#tpu.dimension_semantics<parallel>], iteration_bounds = array<i64: 1>, scalar_prefetch = 0 : i64, scratch_operands = 0 : i64, tpu.core_type = #tpu.core_type<tc>, window_params = [{transform_indices = @transform_0, window_bounds = array<i64: 72, 128>}, {pipeline_mode = #tpu.pipeline_mode<synchronous>, transform_indices = @transform_1, window_bounds = array<i64: 8, 72>}, {pipeline_mode = #tpu.pipeline_mode<synchronous>, transform_indices = @transform_2, window_bounds = array<i64: 8, 1>}, {transform_indices = @transform_3, window_bounds = array<i64: 8, 128>}]} {
    %c0 = arith.constant 0 : index
    %c0_0 = arith.constant 0 : index
    %0 = vector.load %arg1[%c0, %c0_0] : memref<72x128xf32, #tpu.memory_space<vmem>>, vector<72x128xf32>
    %c0_1 = arith.constant 0 : index
    %c0_2 = arith.constant 0 : index
    %1 = vector.load %arg2[%c0_1, %c0_2] : memref<8x72xf32, #tpu.memory_space<vmem>>, vector<8x72xf32>
    %c0_3 = arith.constant 0 : index
    %c0_4 = arith.constant 0 : index
    %2 = vector.load %arg3[%c0_3, %c0_4] : memref<8x1xf32, #tpu.memory_space<vmem>>, vector<8x1xf32>
    %cst = arith.constant dense<0.000000e+00> : vector<8x128xf32>
    %3 = tpu.matmul %1, %0, %cst {dimension_numbers = #tpu.dot_dimension_numbers<[1], [0], [0], [1], [0, 0, 1, 1], [], []>} : vector<8x72xf32>, vector<72x128xf32>, vector<8x128xf32> -> vector<8x128xf32>
    %4 = vector.broadcast %2 : vector<8x1xf32> to vector<8x128xf32>
    %5 = arith.addf %3, %4 : vector<8x128xf32>
    %cst_5 = arith.constant 0.000000e+00 : f32
    %6 = vector.broadcast %cst_5 : f32 to vector<8x128xf32>
    %7 = arith.maximumf %5, %6 : vector<8x128xf32>
    %c0_6 = arith.constant 0 : index
    %c0_7 = arith.constant 0 : index
    %8 = vector.load %arg4[%c0_6, %c0_7] : memref<8x128xf32, #tpu.memory_space<vmem>>, vector<8x128xf32>
    tpu.vector_store %arg4[%c0_6, %c0_7], %7 {strides = array<i32>} : memref<8x128xf32, #tpu.memory_space<vmem>>, vector<8x128xf32>,
    return
  }
  func.func @transform_0(%arg0: i32) -> (i32, i32) {
    %c0_i32 = arith.constant 0 : i32
    %c0_i32_0 = arith.constant 0 : i32
    return %c0_i32, %arg0 : i32, i32
  }
  func.func @transform_1(%arg0: i32) -> (i32, i32) {
    %c0_i32 = arith.constant 0 : i32
    %c0_i32_0 = arith.constant 0 : i32
    %c0_i32_1 = arith.constant 0 : i32
    return %c0_i32, %c0_i32_0 : i32, i32
  }
  func.func @transform_2(%arg0: i32) -> (i32, i32) {
    %c0_i32 = arith.constant 0 : i32
    %c0_i32_0 = arith.constant 0 : i32
    %c0_i32_1 = arith.constant 0 : i32
    return %c0_i32, %c0_i32_0 : i32, i32
  }
  func.func @transform_3(%arg0: i32) -> (i32, i32) {
    %c0_i32 = arith.constant 0 : i32
    %c0_i32_0 = arith.constant 0 : i32
    return %c0_i32, %arg0 : i32, i32
  }
}

module attributes {stable_mosaic.version = 11 : i64} {
  func.func @_conv_mm_kernel(%arg0: i32, %arg1: memref<72x32xf32, #tpu.memory_space<vmem>>, %arg2: memref<8x72xf32, #tpu.memory_space<vmem>>, %arg3: memref<8x1xf32, #tpu.memory_space<vmem>>, %arg4: memref<8x32xf32, #tpu.memory_space<vmem>>) attributes {dimension_semantics = [#tpu.dimension_semantics<parallel>], iteration_bounds = array<i64: 1>, scalar_prefetch = 0 : i64, scratch_operands = 0 : i64, tpu.core_type = #tpu.core_type<tc>, window_params = [{transform_indices = @transform_0, window_bounds = array<i64: 72, 32>}, {pipeline_mode = #tpu.pipeline_mode<synchronous>, transform_indices = @transform_1, window_bounds = array<i64: 8, 72>}, {pipeline_mode = #tpu.pipeline_mode<synchronous>, transform_indices = @transform_2, window_bounds = array<i64: 8, 1>}, {transform_indices = @transform_3, window_bounds = array<i64: 8, 32>}]} {
    %c0 = arith.constant 0 : index
    %c0_0 = arith.constant 0 : index
    %0 = vector.load %arg1[%c0, %c0_0] : memref<72x32xf32, #tpu.memory_space<vmem>>, vector<72x32xf32>
    %c0_1 = arith.constant 0 : index
    %c0_2 = arith.constant 0 : index
    %1 = vector.load %arg2[%c0_1, %c0_2] : memref<8x72xf32, #tpu.memory_space<vmem>>, vector<8x72xf32>
    %c0_3 = arith.constant 0 : index
    %c0_4 = arith.constant 0 : index
    %2 = vector.load %arg3[%c0_3, %c0_4] : memref<8x1xf32, #tpu.memory_space<vmem>>, vector<8x1xf32>
    %cst = arith.constant dense<0.000000e+00> : vector<8x32xf32>
    %3 = tpu.matmul %1, %0, %cst {dimension_numbers = #tpu.dot_dimension_numbers<[1], [0], [0], [1], [0, 0, 1, 1], [], []>} : vector<8x72xf32>, vector<72x32xf32>, vector<8x32xf32> -> vector<8x32xf32>
    %4 = vector.broadcast %2 : vector<8x1xf32> to vector<8x32xf32>
    %5 = arith.addf %3, %4 : vector<8x32xf32>
    %cst_5 = arith.constant 0.000000e+00 : f32
    %6 = vector.broadcast %cst_5 : f32 to vector<8x32xf32>
    %7 = arith.maximumf %5, %6 : vector<8x32xf32>
    %c0_6 = arith.constant 0 : index
    %c0_7 = arith.constant 0 : index
    %8 = vector.load %arg4[%c0_6, %c0_7] : memref<8x32xf32, #tpu.memory_space<vmem>>, vector<8x32xf32>
    tpu.vector_store %arg4[%c0_6, %c0_7], %7 {strides = array<i32>} : memref<8x32xf32, #tpu.memory_space<vmem>>, vector<8x32xf32>,
    return
  }
  func.func @transform_0(%arg0: i32) -> (i32, i32) {
    %c0_i32 = arith.constant 0 : i32
    %c0_i32_0 = arith.constant 0 : i32
    return %c0_i32, %arg0 : i32, i32
  }
  func.func @transform_1(%arg0: i32) -> (i32, i32) {
    %c0_i32 = arith.constant 0 : i32
    %c0_i32_0 = arith.constant 0 : i32
    %c0_i32_1 = arith.constant 0 : i32
    return %c0_i32, %c0_i32_0 : i32, i32
  }
  func.func @transform_2(%arg0: i32) -> (i32, i32) {
    %c0_i32 = arith.constant 0 : i32
    %c0_i32_0 = arith.constant 0 : i32
    %c0_i32_1 = arith.constant 0 : i32
    return %c0_i32, %c0_i32_0 : i32, i32
  }
  func.func @transform_3(%arg0: i32) -> (i32, i32) {
    %c0_i32 = arith.constant 0 : i32
    %c0_i32_0 = arith.constant 0 : i32
    return %c0_i32, %arg0 : i32, i32
  }
}

module attributes {stable_mosaic.version = 11 : i64} {
  func.func @_mhsa_kernel(%arg0: i32, %arg1: memref<2x4x8xf32, #tpu.memory_space<vmem>>, %arg2: memref<8x24xf32, #tpu.memory_space<vmem>>, %arg3: memref<1x24xf32, #tpu.memory_space<vmem>>, %arg4: memref<8x8xf32, #tpu.memory_space<vmem>>, %arg5: memref<1x8xf32, #tpu.memory_space<vmem>>, %arg6: memref<2x4x8xf32, #tpu.memory_space<vmem>>) attributes {dimension_semantics = [#tpu.dimension_semantics<arbitrary>], iteration_bounds = array<i64: 1>, scalar_prefetch = 0 : i64, scratch_operands = 0 : i64, tpu.core_type = #tpu.core_type<tc>, window_params = [{pipeline_mode = #tpu.pipeline_mode<synchronous>, transform_indices = @transform_0, window_bounds = array<i64: 2, 4, 8>}, {pipeline_mode = #tpu.pipeline_mode<synchronous>, transform_indices = @transform_1, window_bounds = array<i64: 8, 24>}, {pipeline_mode = #tpu.pipeline_mode<synchronous>, transform_indices = @transform_2, window_bounds = array<i64: 1, 24>}, {pipeline_mode = #tpu.pipeline_mode<synchronous>, transform_indices = @transform_3, window_bounds = array<i64: 8, 8>}, {pipeline_mode = #tpu.pipeline_mode<synchronous>, transform_indices = @transform_4, window_bounds = array<i64: 1, 8>}, {pipeline_mode = #tpu.pipeline_mode<synchronous>, transform_indices = @transform_5, window_bounds = array<i64: 2, 4, 8>}]} {
    %c0 = arith.constant 0 : index
    %c0_0 = arith.constant 0 : index
    %c0_1 = arith.constant 0 : index
    %0 = vector.load %arg1[%c0, %c0_0, %c0_1] : memref<2x4x8xf32, #tpu.memory_space<vmem>>, vector<2x4x8xf32>
    %1 = vector.shape_cast %0 : vector<2x4x8xf32> to vector<8x8xf32>
    %c0_2 = arith.constant 0 : index
    %c0_3 = arith.constant 0 : index
    %2 = vector.load %arg2[%c0_2, %c0_3] : memref<8x24xf32, #tpu.memory_space<vmem>>, vector<8x24xf32>
    %cst = arith.constant dense<0.000000e+00> : vector<8x24xf32>
    %3 = tpu.matmul %1, %2, %cst {dimension_numbers = #tpu.dot_dimension_numbers<[1], [0], [0], [1], [0, 0, 1, 1], [], []>} : vector<8x8xf32>, vector<8x24xf32>, vector<8x24xf32> -> vector<8x24xf32>
    %c0_4 = arith.constant 0 : index
    %c0_5 = arith.constant 0 : index
    %4 = vector.load %arg3[%c0_4, %c0_5] : memref<1x24xf32, #tpu.memory_space<vmem>>, vector<1x24xf32>
    %5 = vector.broadcast %4 : vector<1x24xf32> to vector<8x24xf32>
    %6 = arith.addf %3, %5 : vector<8x24xf32>
    %7 = vector.shape_cast %6 : vector<8x24xf32> to vector<2x4x24xf32>
    %8 = vector.extract_strided_slice %7 {offsets = [0, 0, 0], sizes = [2, 4, 2], strides = [1, 1, 1]} : vector<2x4x24xf32> to vector<2x4x2xf32>
    %9 = vector.extract_strided_slice %7 {offsets = [0, 0, 8], sizes = [2, 4, 2], strides = [1, 1, 1]} : vector<2x4x24xf32> to vector<2x4x2xf32>
    %10 = vector.extract_strided_slice %7 {offsets = [0, 0, 16], sizes = [2, 4, 2], strides = [1, 1, 1]} : vector<2x4x24xf32> to vector<2x4x2xf32>
    "tpu.trace_start"() <{level = 10 : i32, message = "bqd,bkd->bqk"}> : () -> ()
    %cst_6 = arith.constant dense<0.000000e+00> : vector<2x4x4xf32>
    %11 = tpu.matmul %8, %9, %cst_6 {dimension_numbers = #tpu.dot_dimension_numbers<[2], [2], [1], [1], [0, 0, 0, 1, 1, 1], [0], [0]>} : vector<2x4x2xf32>, vector<2x4x2xf32>, vector<2x4x4xf32> -> vector<2x4x4xf32>
    "tpu.trace_stop"() : () -> ()
    %cst_7 = arith.constant 0.707106769 : f32
    %12 = vector.broadcast %cst_7 : f32 to vector<2x4x4xf32>
    %13 = arith.mulf %11, %12 : vector<2x4x4xf32>
    %cst_8 = arith.constant dense<0xFF800000> : vector<2x4xf32>
    %14 = vector.multi_reduction <maximumf>, %13, %cst_8 [2] : vector<2x4x4xf32> to vector<2x4xf32>
    %15 = vector.shape_cast %14 : vector<2x4xf32> to vector<2x4x1xf32>
    %16 = vector.broadcast %15 : vector<2x4x1xf32> to vector<2x4x4xf32>
    %17 = arith.subf %13, %16 : vector<2x4x4xf32>
    %18 = math.exp %17 : vector<2x4x4xf32>
    %cst_9 = arith.constant dense<0.000000e+00> : vector<2x4xf32>
    %19 = vector.multi_reduction <add>, %18, %cst_9 [2] : vector<2x4x4xf32> to vector<2x4xf32>
    %20 = vector.shape_cast %19 : vector<2x4xf32> to vector<2x4x1xf32>
    %21 = tpu.reciprocal %20 {approx = true} : vector<2x4x1xf32> -> vector<2x4x1xf32>
    %22 = vector.broadcast %21 : vector<2x4x1xf32> to vector<2x4x4xf32>
    %23 = arith.mulf %18, %22 : vector<2x4x4xf32>
    "tpu.trace_start"() <{level = 10 : i32, message = "bqk,bkd->bqd"}> : () -> ()
    %cst_10 = arith.constant dense<0.000000e+00> : vector<2x4x2xf32>
    %24 = tpu.matmul %23, %10, %cst_10 {dimension_numbers = #tpu.dot_dimension_numbers<[2], [1], [1], [2], [0, 0, 0, 1, 1, 2], [0], [0]>} : vector<2x4x4xf32>, vector<2x4x2xf32>, vector<2x4x2xf32> -> vector<2x4x2xf32>
    "tpu.trace_stop"() : () -> ()
    %25 = vector.extract_strided_slice %7 {offsets = [0, 0, 2], sizes = [2, 4, 2], strides = [1, 1, 1]} : vector<2x4x24xf32> to vector<2x4x2xf32>
    %26 = vector.extract_strided_slice %7 {offsets = [0, 0, 10], sizes = [2, 4, 2], strides = [1, 1, 1]} : vector<2x4x24xf32> to vector<2x4x2xf32>
    %27 = vector.extract_strided_slice %7 {offsets = [0, 0, 18], sizes = [2, 4, 2], strides = [1, 1, 1]} : vector<2x4x24xf32> to vector<2x4x2xf32>
    "tpu.trace_start"() <{level = 10 : i32, message = "bqd,bkd->bqk"}> : () -> ()
    %cst_11 = arith.constant dense<0.000000e+00> : vector<2x4x4xf32>
    %28 = tpu.matmul %25, %26, %cst_11 {dimension_numbers = #tpu.dot_dimension_numbers<[2], [2], [1], [1], [0, 0, 0, 1, 1, 1], [0], [0]>} : vector<2x4x2xf32>, vector<2x4x2xf32>, vector<2x4x4xf32> -> vector<2x4x4xf32>
    "tpu.trace_stop"() : () -> ()
    %cst_12 = arith.constant 0.707106769 : f32
    %29 = vector.broadcast %cst_12 : f32 to vector<2x4x4xf32>
    %30 = arith.mulf %28, %29 : vector<2x4x4xf32>
    %cst_13 = arith.constant dense<0xFF800000> : vector<2x4xf32>
    %31 = vector.multi_reduction <maximumf>, %30, %cst_13 [2] : vector<2x4x4xf32> to vector<2x4xf32>
    %32 = vector.shape_cast %31 : vector<2x4xf32> to vector<2x4x1xf32>
    %33 = vector.broadcast %32 : vector<2x4x1xf32> to vector<2x4x4xf32>
    %34 = arith.subf %30, %33 : vector<2x4x4xf32>
    %35 = math.exp %34 : vector<2x4x4xf32>
    %cst_14 = arith.constant dense<0.000000e+00> : vector<2x4xf32>
    %36 = vector.multi_reduction <add>, %35, %cst_14 [2] : vector<2x4x4xf32> to vector<2x4xf32>
    %37 = vector.shape_cast %36 : vector<2x4xf32> to vector<2x4x1xf32>
    %38 = tpu.reciprocal %37 {approx = true} : vector<2x4x1xf32> -> vector<2x4x1xf32>
    %39 = vector.broadcast %38 : vector<2x4x1xf32> to vector<2x4x4xf32>
    %40 = arith.mulf %35, %39 : vector<2x4x4xf32>
    "tpu.trace_start"() <{level = 10 : i32, message = "bqk,bkd->bqd"}> : () -> ()
    %cst_15 = arith.constant dense<0.000000e+00> : vector<2x4x2xf32>
    %41 = tpu.matmul %40, %27, %cst_15 {dimension_numbers = #tpu.dot_dimension_numbers<[2], [1], [1], [2], [0, 0, 0, 1, 1, 2], [0], [0]>} : vector<2x4x4xf32>, vector<2x4x2xf32>, vector<2x4x2xf32> -> vector<2x4x2xf32>
    "tpu.trace_stop"() : () -> ()
    %42 = vector.extract_strided_slice %7 {offsets = [0, 0, 4], sizes = [2, 4, 2], strides = [1, 1, 1]} : vector<2x4x24xf32> to vector<2x4x2xf32>
    %43 = vector.extract_strided_slice %7 {offsets = [0, 0, 12], sizes = [2, 4, 2], strides = [1, 1, 1]} : vector<2x4x24xf32> to vector<2x4x2xf32>
    %44 = vector.extract_strided_slice %7 {offsets = [0, 0, 20], sizes = [2, 4, 2], strides = [1, 1, 1]} : vector<2x4x24xf32> to vector<2x4x2xf32>
    "tpu.trace_start"() <{level = 10 : i32, message = "bqd,bkd->bqk"}> : () -> ()
    %cst_16 = arith.constant dense<0.000000e+00> : vector<2x4x4xf32>
    %45 = tpu.matmul %42, %43, %cst_16 {dimension_numbers = #tpu.dot_dimension_numbers<[2], [2], [1], [1], [0, 0, 0, 1, 1, 1], [0], [0]>} : vector<2x4x2xf32>, vector<2x4x2xf32>, vector<2x4x4xf32> -> vector<2x4x4xf32>
    "tpu.trace_stop"() : () -> ()
    %cst_17 = arith.constant 0.707106769 : f32
    %46 = vector.broadcast %cst_17 : f32 to vector<2x4x4xf32>
    %47 = arith.mulf %45, %46 : vector<2x4x4xf32>
    %cst_18 = arith.constant dense<0xFF800000> : vector<2x4xf32>
    %48 = vector.multi_reduction <maximumf>, %47, %cst_18 [2] : vector<2x4x4xf32> to vector<2x4xf32>
    %49 = vector.shape_cast %48 : vector<2x4xf32> to vector<2x4x1xf32>
    %50 = vector.broadcast %49 : vector<2x4x1xf32> to vector<2x4x4xf32>
    %51 = arith.subf %47, %50 : vector<2x4x4xf32>
    %52 = math.exp %51 : vector<2x4x4xf32>
    %cst_19 = arith.constant dense<0.000000e+00> : vector<2x4xf32>
    %53 = vector.multi_reduction <add>, %52, %cst_19 [2] : vector<2x4x4xf32> to vector<2x4xf32>
    %54 = vector.shape_cast %53 : vector<2x4xf32> to vector<2x4x1xf32>
    %55 = tpu.reciprocal %54 {approx = true} : vector<2x4x1xf32> -> vector<2x4x1xf32>
    %56 = vector.broadcast %55 : vector<2x4x1xf32> to vector<2x4x4xf32>
    %57 = arith.mulf %52, %56 : vector<2x4x4xf32>
    "tpu.trace_start"() <{level = 10 : i32, message = "bqk,bkd->bqd"}> : () -> ()
    %cst_20 = arith.constant dense<0.000000e+00> : vector<2x4x2xf32>
    %58 = tpu.matmul %57, %44, %cst_20 {dimension_numbers = #tpu.dot_dimension_numbers<[2], [1], [1], [2], [0, 0, 0, 1, 1, 2], [0], [0]>} : vector<2x4x4xf32>, vector<2x4x2xf32>, vector<2x4x2xf32> -> vector<2x4x2xf32>
    "tpu.trace_stop"() : () -> ()
    %59 = vector.extract_strided_slice %7 {offsets = [0, 0, 6], sizes = [2, 4, 2], strides = [1, 1, 1]} : vector<2x4x24xf32> to vector<2x4x2xf32>
    %60 = vector.extract_strided_slice %7 {offsets = [0, 0, 14], sizes = [2, 4, 2], strides = [1, 1, 1]} : vector<2x4x24xf32> to vector<2x4x2xf32>
    %61 = vector.extract_strided_slice %7 {offsets = [0, 0, 22], sizes = [2, 4, 2], strides = [1, 1, 1]} : vector<2x4x24xf32> to vector<2x4x2xf32>
    "tpu.trace_start"() <{level = 10 : i32, message = "bqd,bkd->bqk"}> : () -> ()
    %cst_21 = arith.constant dense<0.000000e+00> : vector<2x4x4xf32>
    %62 = tpu.matmul %59, %60, %cst_21 {dimension_numbers = #tpu.dot_dimension_numbers<[2], [2], [1], [1], [0, 0, 0, 1, 1, 1], [0], [0]>} : vector<2x4x2xf32>, vector<2x4x2xf32>, vector<2x4x4xf32> -> vector<2x4x4xf32>
    "tpu.trace_stop"() : () -> ()
    %cst_22 = arith.constant 0.707106769 : f32
    %63 = vector.broadcast %cst_22 : f32 to vector<2x4x4xf32>
    %64 = arith.mulf %62, %63 : vector<2x4x4xf32>
    %cst_23 = arith.constant dense<0xFF800000> : vector<2x4xf32>
    %65 = vector.multi_reduction <maximumf>, %64, %cst_23 [2] : vector<2x4x4xf32> to vector<2x4xf32>
    %66 = vector.shape_cast %65 : vector<2x4xf32> to vector<2x4x1xf32>
    %67 = vector.broadcast %66 : vector<2x4x1xf32> to vector<2x4x4xf32>
    %68 = arith.subf %64, %67 : vector<2x4x4xf32>
    %69 = math.exp %68 : vector<2x4x4xf32>
    %cst_24 = arith.constant dense<0.000000e+00> : vector<2x4xf32>
    %70 = vector.multi_reduction <add>, %69, %cst_24 [2] : vector<2x4x4xf32> to vector<2x4xf32>
    %71 = vector.shape_cast %70 : vector<2x4xf32> to vector<2x4x1xf32>
    %72 = tpu.reciprocal %71 {approx = true} : vector<2x4x1xf32> -> vector<2x4x1xf32>
    %73 = vector.broadcast %72 : vector<2x4x1xf32> to vector<2x4x4xf32>
    %74 = arith.mulf %69, %73 : vector<2x4x4xf32>
    "tpu.trace_start"() <{level = 10 : i32, message = "bqk,bkd->bqd"}> : () -> ()
    %cst_25 = arith.constant dense<0.000000e+00> : vector<2x4x2xf32>
    %75 = tpu.matmul %74, %61, %cst_25 {dimension_numbers = #tpu.dot_dimension_numbers<[2], [1], [1], [2], [0, 0, 0, 1, 1, 2], [0], [0]>} : vector<2x4x4xf32>, vector<2x4x2xf32>, vector<2x4x2xf32> -> vector<2x4x2xf32>
    "tpu.trace_stop"() : () -> ()
    %76 = tpu.concatenate %24, %41, %58, %75 in 2 : vector<2x4x2xf32>, vector<2x4x2xf32>, vector<2x4x2xf32>, vector<2x4x2xf32> -> vector<2x4x8xf32>
    %77 = vector.shape_cast %76 : vector<2x4x8xf32> to vector<8x8xf32>
    %c0_26 = arith.constant 0 : index
    %c0_27 = arith.constant 0 : index
    %78 = vector.load %arg4[%c0_26, %c0_27] : memref<8x8xf32, #tpu.memory_space<vmem>>, vector<8x8xf32>
    %cst_28 = arith.constant dense<0.000000e+00> : vector<8x8xf32>
    %79 = tpu.matmul %77, %78, %cst_28 {dimension_numbers = #tpu.dot_dimension_numbers<[1], [0], [0], [1], [0, 0, 1, 1], [], []>} : vector<8x8xf32>, vector<8x8xf32>, vector<8x8xf32> -> vector<8x8xf32>
    %c0_29 = arith.constant 0 : index
    %c0_30 = arith.constant 0 : index
    %80 = vector.load %arg5[%c0_29, %c0_30] : memref<1x8xf32, #tpu.memory_space<vmem>>, vector<1x8xf32>
    %81 = vector.broadcast %80 : vector<1x8xf32> to vector<8x8xf32>
    %82 = arith.addf %79, %81 : vector<8x8xf32>
    %83 = vector.shape_cast %82 : vector<8x8xf32> to vector<2x4x8xf32>
    %c0_31 = arith.constant 0 : index
    %c0_32 = arith.constant 0 : index
    %c0_33 = arith.constant 0 : index
    %84 = vector.load %arg6[%c0_31, %c0_32, %c0_33] : memref<2x4x8xf32, #tpu.memory_space<vmem>>, vector<2x4x8xf32>
    tpu.vector_store %arg6[%c0_31, %c0_32, %c0_33], %83 {strides = array<i32>} : memref<2x4x8xf32, #tpu.memory_space<vmem>>, vector<2x4x8xf32>,
    return
  }
  func.func @transform_0(%arg0: i32) -> (i32, i32, i32) {
    %c0_i32 = arith.constant 0 : i32
    %c0_i32_0 = arith.constant 0 : i32
    %c0_i32_1 = arith.constant 0 : i32
    %c0_i32_2 = arith.constant 0 : i32
    return %c0_i32, %c0_i32_0, %c0_i32_1 : i32, i32, i32
  }
  func.func @transform_1(%arg0: i32) -> (i32, i32) {
    %c0_i32 = arith.constant 0 : i32
    %c0_i32_0 = arith.constant 0 : i32
    %c0_i32_1 = arith.constant 0 : i32
    return %c0_i32, %c0_i32_0 : i32, i32
  }
  func.func @transform_2(%arg0: i32) -> (i32, i32) {
    %c0_i32 = arith.constant 0 : i32
    %c0_i32_0 = arith.constant 0 : i32
    %c0_i32_1 = arith.constant 0 : i32
    return %c0_i32, %c0_i32_0 : i32, i32
  }
  func.func @transform_3(%arg0: i32) -> (i32, i32) {
    %c0_i32 = arith.constant 0 : i32
    %c0_i32_0 = arith.constant 0 : i32
    %c0_i32_1 = arith.constant 0 : i32
    return %c0_i32, %c0_i32_0 : i32, i32
  }
  func.func @transform_4(%arg0: i32) -> (i32, i32) {
    %c0_i32 = arith.constant 0 : i32
    %c0_i32_0 = arith.constant 0 : i32
    %c0_i32_1 = arith.constant 0 : i32
    return %c0_i32, %c0_i32_0 : i32, i32
  }
  func.func @transform_5(%arg0: i32) -> (i32, i32, i32) {
    %c0_i32 = arith.constant 0 : i32
    %c0_i32_0 = arith.constant 0 : i32
    %c0_i32_1 = arith.constant 0 : i32
    %c0_i32_2 = arith.constant 0 : i32
    return %c0_i32, %c0_i32_0, %c0_i32_1 : i32, i32, i32
  }
}

module attributes {stable_mosaic.version = 11 : i64} {
  func.func @_conv_mm_kernel(%arg0: i32, %arg1: memref<72x8xf32, #tpu.memory_space<vmem>>, %arg2: memref<8x72xf32, #tpu.memory_space<vmem>>, %arg3: memref<8x1xf32, #tpu.memory_space<vmem>>, %arg4: memref<8x8xf32, #tpu.memory_space<vmem>>) attributes {dimension_semantics = [#tpu.dimension_semantics<parallel>], iteration_bounds = array<i64: 1>, scalar_prefetch = 0 : i64, scratch_operands = 0 : i64, tpu.core_type = #tpu.core_type<tc>, window_params = [{transform_indices = @transform_0, window_bounds = array<i64: 72, 8>}, {pipeline_mode = #tpu.pipeline_mode<synchronous>, transform_indices = @transform_1, window_bounds = array<i64: 8, 72>}, {pipeline_mode = #tpu.pipeline_mode<synchronous>, transform_indices = @transform_2, window_bounds = array<i64: 8, 1>}, {transform_indices = @transform_3, window_bounds = array<i64: 8, 8>}]} {
    %c0 = arith.constant 0 : index
    %c0_0 = arith.constant 0 : index
    %0 = vector.load %arg1[%c0, %c0_0] : memref<72x8xf32, #tpu.memory_space<vmem>>, vector<72x8xf32>
    %c0_1 = arith.constant 0 : index
    %c0_2 = arith.constant 0 : index
    %1 = vector.load %arg2[%c0_1, %c0_2] : memref<8x72xf32, #tpu.memory_space<vmem>>, vector<8x72xf32>
    %c0_3 = arith.constant 0 : index
    %c0_4 = arith.constant 0 : index
    %2 = vector.load %arg3[%c0_3, %c0_4] : memref<8x1xf32, #tpu.memory_space<vmem>>, vector<8x1xf32>
    %cst = arith.constant dense<0.000000e+00> : vector<8x8xf32>
    %3 = tpu.matmul %1, %0, %cst {dimension_numbers = #tpu.dot_dimension_numbers<[1], [0], [0], [1], [0, 0, 1, 1], [], []>} : vector<8x72xf32>, vector<72x8xf32>, vector<8x8xf32> -> vector<8x8xf32>
    %4 = vector.broadcast %2 : vector<8x1xf32> to vector<8x8xf32>
    %5 = arith.addf %3, %4 : vector<8x8xf32>
    %cst_5 = arith.constant 0.000000e+00 : f32
    %6 = vector.broadcast %cst_5 : f32 to vector<8x8xf32>
    %7 = arith.maximumf %5, %6 : vector<8x8xf32>
    %c0_6 = arith.constant 0 : index
    %c0_7 = arith.constant 0 : index
    %8 = vector.load %arg4[%c0_6, %c0_7] : memref<8x8xf32, #tpu.memory_space<vmem>>, vector<8x8xf32>
    tpu.vector_store %arg4[%c0_6, %c0_7], %7 {strides = array<i32>} : memref<8x8xf32, #tpu.memory_space<vmem>>, vector<8x8xf32>,
    return
  }
  func.func @transform_0(%arg0: i32) -> (i32, i32) {
    %c0_i32 = arith.constant 0 : i32
    %c0_i32_0 = arith.constant 0 : i32
    return %c0_i32, %arg0 : i32, i32
  }
  func.func @transform_1(%arg0: i32) -> (i32, i32) {
    %c0_i32 = arith.constant 0 : i32
    %c0_i32_0 = arith.constant 0 : i32
    %c0_i32_1 = arith.constant 0 : i32
    return %c0_i32, %c0_i32_0 : i32, i32
  }
  func.func @transform_2(%arg0: i32) -> (i32, i32) {
    %c0_i32 = arith.constant 0 : i32
    %c0_i32_0 = arith.constant 0 : i32
    %c0_i32_1 = arith.constant 0 : i32
    return %c0_i32, %c0_i32_0 : i32, i32
  }
  func.func @transform_3(%arg0: i32) -> (i32, i32) {
    %c0_i32 = arith.constant 0 : i32
    %c0_i32_0 = arith.constant 0 : i32
    return %c0_i32, %arg0 : i32, i32
  }
}

module attributes {stable_mosaic.version = 11 : i64} {
  func.func @_conv_mm_kernel(%arg0: i32, %arg1: memref<72x256xf32, #tpu.memory_space<vmem>>, %arg2: memref<1x72xf32, #tpu.memory_space<vmem>>, %arg3: memref<1x1xf32, #tpu.memory_space<vmem>>, %arg4: memref<1x256xf32, #tpu.memory_space<vmem>>) attributes {dimension_semantics = [#tpu.dimension_semantics<parallel>], iteration_bounds = array<i64: 2>, scalar_prefetch = 0 : i64, scratch_operands = 0 : i64, tpu.core_type = #tpu.core_type<tc>, window_params = [{transform_indices = @transform_0, window_bounds = array<i64: 72, 256>}, {pipeline_mode = #tpu.pipeline_mode<synchronous>, transform_indices = @transform_1, window_bounds = array<i64: 1, 72>}, {pipeline_mode = #tpu.pipeline_mode<synchronous>, transform_indices = @transform_2, window_bounds = array<i64: 1, 1>}, {transform_indices = @transform_3, window_bounds = array<i64: 1, 256>}]} {
    %c0 = arith.constant 0 : index
    %c0_0 = arith.constant 0 : index
    %0 = vector.load %arg1[%c0, %c0_0] : memref<72x256xf32, #tpu.memory_space<vmem>>, vector<72x256xf32>
    %c0_1 = arith.constant 0 : index
    %c0_2 = arith.constant 0 : index
    %1 = vector.load %arg2[%c0_1, %c0_2] : memref<1x72xf32, #tpu.memory_space<vmem>>, vector<1x72xf32>
    %c0_3 = arith.constant 0 : index
    %c0_4 = arith.constant 0 : index
    %2 = vector.load %arg3[%c0_3, %c0_4] : memref<1x1xf32, #tpu.memory_space<vmem>>, vector<1x1xf32>
    %cst = arith.constant dense<0.000000e+00> : vector<1x256xf32>
    %3 = tpu.matmul %1, %0, %cst {dimension_numbers = #tpu.dot_dimension_numbers<[1], [0], [0], [1], [0, 0, 1, 1], [], []>} : vector<1x72xf32>, vector<72x256xf32>, vector<1x256xf32> -> vector<1x256xf32>
    %4 = vector.broadcast %2 : vector<1x1xf32> to vector<1x256xf32>
    %5 = arith.addf %3, %4 : vector<1x256xf32>
    %c0_5 = arith.constant 0 : index
    %c0_6 = arith.constant 0 : index
    %6 = vector.load %arg4[%c0_5, %c0_6] : memref<1x256xf32, #tpu.memory_space<vmem>>, vector<1x256xf32>
    tpu.vector_store %arg4[%c0_5, %c0_6], %5 {strides = array<i32>} : memref<1x256xf32, #tpu.memory_space<vmem>>, vector<1x256xf32>,
    return
  }
  func.func @transform_0(%arg0: i32) -> (i32, i32) {
    %c0_i32 = arith.constant 0 : i32
    %c0_i32_0 = arith.constant 0 : i32
    return %c0_i32, %arg0 : i32, i32
  }
  func.func @transform_1(%arg0: i32) -> (i32, i32) {
    %c0_i32 = arith.constant 0 : i32
    %c0_i32_0 = arith.constant 0 : i32
    %c0_i32_1 = arith.constant 0 : i32
    return %c0_i32, %c0_i32_0 : i32, i32
  }
  func.func @transform_2(%arg0: i32) -> (i32, i32) {
    %c0_i32 = arith.constant 0 : i32
    %c0_i32_0 = arith.constant 0 : i32
    %c0_i32_1 = arith.constant 0 : i32
    return %c0_i32, %c0_i32_0 : i32, i32
  }
  func.func @transform_3(%arg0: i32) -> (i32, i32) {
    %c0_i32 = arith.constant 0 : i32
    %c0_i32_0 = arith.constant 0 : i32
    return %c0_i32, %arg0 : i32, i32
  }
}

module attributes {stable_mosaic.version = 11 : i64} {
  func.func @_conv_mm_kernel(%arg0: i32, %arg1: memref<9x256xf32, #tpu.memory_space<vmem>>, %arg2: memref<1x9xf32, #tpu.memory_space<vmem>>, %arg3: memref<1x1xf32, #tpu.memory_space<vmem>>, %arg4: memref<1x256xf32, #tpu.memory_space<vmem>>) attributes {dimension_semantics = [#tpu.dimension_semantics<parallel>], iteration_bounds = array<i64: 2>, scalar_prefetch = 0 : i64, scratch_operands = 0 : i64, tpu.core_type = #tpu.core_type<tc>, window_params = [{transform_indices = @transform_0, window_bounds = array<i64: 9, 256>}, {pipeline_mode = #tpu.pipeline_mode<synchronous>, transform_indices = @transform_1, window_bounds = array<i64: 1, 9>}, {pipeline_mode = #tpu.pipeline_mode<synchronous>, transform_indices = @transform_2, window_bounds = array<i64: 1, 1>}, {transform_indices = @transform_3, window_bounds = array<i64: 1, 256>}]} {
    %c0 = arith.constant 0 : index
    %c0_0 = arith.constant 0 : index
    %0 = vector.load %arg1[%c0, %c0_0] : memref<9x256xf32, #tpu.memory_space<vmem>>, vector<9x256xf32>
    %c0_1 = arith.constant 0 : index
    %c0_2 = arith.constant 0 : index
    %1 = vector.load %arg2[%c0_1, %c0_2] : memref<1x9xf32, #tpu.memory_space<vmem>>, vector<1x9xf32>
    %c0_3 = arith.constant 0 : index
    %c0_4 = arith.constant 0 : index
    %2 = vector.load %arg3[%c0_3, %c0_4] : memref<1x1xf32, #tpu.memory_space<vmem>>, vector<1x1xf32>
    %cst = arith.constant dense<0.000000e+00> : vector<1x256xf32>
    %3 = tpu.matmul %1, %0, %cst {dimension_numbers = #tpu.dot_dimension_numbers<[1], [0], [0], [1], [0, 0, 1, 1], [], []>} : vector<1x9xf32>, vector<9x256xf32>, vector<1x256xf32> -> vector<1x256xf32>
    %4 = vector.broadcast %2 : vector<1x1xf32> to vector<1x256xf32>
    %5 = arith.addf %3, %4 : vector<1x256xf32>
    %6 = math.tanh %5 : vector<1x256xf32>
    %c0_5 = arith.constant 0 : index
    %c0_6 = arith.constant 0 : index
    %7 = vector.load %arg4[%c0_5, %c0_6] : memref<1x256xf32, #tpu.memory_space<vmem>>, vector<1x256xf32>
    tpu.vector_store %arg4[%c0_5, %c0_6], %6 {strides = array<i32>} : memref<1x256xf32, #tpu.memory_space<vmem>>, vector<1x256xf32>,
    return
  }
  func.func @transform_0(%arg0: i32) -> (i32, i32) {
    %c0_i32 = arith.constant 0 : i32
    %c0_i32_0 = arith.constant 0 : i32
    return %c0_i32, %arg0 : i32, i32
  }
  func.func @transform_1(%arg0: i32) -> (i32, i32) {
    %c0_i32 = arith.constant 0 : i32
    %c0_i32_0 = arith.constant 0 : i32
    %c0_i32_1 = arith.constant 0 : i32
    return %c0_i32, %c0_i32_0 : i32, i32
  }
  func.func @transform_2(%arg0: i32) -> (i32, i32) {
    %c0_i32 = arith.constant 0 : i32
    %c0_i32_0 = arith.constant 0 : i32
    %c0_i32_1 = arith.constant 0 : i32
    return %c0_i32, %c0_i32_0 : i32, i32
  }
  func.func @transform_3(%arg0: i32) -> (i32, i32) {
    %c0_i32 = arith.constant 0 : i32
    %c0_i32_0 = arith.constant 0 : i32
    return %c0_i32, %arg0 : i32, i32
  }
}

</mosaic_0001>

<bundles_post_ra>
// kernel: denoiser_forward.7
= control target key start
LH: loop header
LB: loop body
LE: loop exit
PB: predicated region body
PF: predicated region fallthrough
CT: control target
= control target key end

     0   :  { %s448_s12 = smov 0   ;;  %s450_s13 = smov 0   ;;  %s506_s0 = inlined_call_operand.vmem [shape: f32[9,512], index: 0, kind: input, shape index: {}]   ;;  %s507_s1 = inlined_call_operand.vmem [shape: f32[8,9], index: 1, kind: input, shape index: {}]   ;;  %s508_s2 = inlined_call_operand.vmem [shape: f32[8,1], index: 2, kind: input, shape index: {}]   ;;  %s509_s3 = inlined_call_operand.vmem [shape: f32[8,512], index: 3, kind: output, shape index: {}]  }
   0x1   :  { %s452_s14 = smov 0  }
   0x2 LB: > { %s358_s15 = sadd.s32 4294967295, %s424_s14   ;;  %s465_s16 = sadd.s32 1, %s424_s14   ;;  %s424_s14 = sphi %s452_s14, %s512_s14   ;;  %s420_s13 = sphi %s450_s13, %s511_s13   ;;  %s416_s12 = sphi %s448_s12, %s510_s12  }
   0x3   : > { %s17_s17 = ssub.s32 %s424_s14, %s465_s16  ;;  %s20_s18 = sadd.s32 1, %s420_s13 }
   0x4   : > { %p18_p0 = scmp.eq.s32.totalorder %s17_s17, 0  ;;  %p27_p1 = scmp.ne.s32.totalorder %s420_s13, %s416_s12 }
   0x5   : > { %p28_p2 = scmp.eq.s32.totalorder %s424_s14, 0  ;;  %p361_p4 = scmp.ge.s32.totalorder %s424_s14, 2 }
   0x6   : > { %s474_s19 = scalar_select %p18_p0, %s420_s13, %s20_s18  }
   0x7   : > { %p29_p3 = por %p28_p2, %p27_p1  ;;  %127 = sbr.rel (%p361_p4) target bundleno = 18 (0x12), region = 24 }
   0xc   : > { %130 = sbr.rel (!%p29_p3) target bundleno = 18 (0x12), region = 28  ;;  %s132_s20 = sand.u32 (%p29_p3), 1, %s420_s13  }
   0xd   : > { %s374_s21 = sshll.u32 (%p29_p3), %s424_s14, 4  ;;  %s362_s22 = sshll.u32 (%p29_p3), %s132_s20, 5 }
   0xe   : > { %s137_s25 = scalar_lea.vmem (%p29_p3), %s506_s0, %s374_s21  ;;  %s134_s26 = scalar_lea.vmem (%p29_p3), [#allocation2], %s362_s22 }
   0xf   : > { %v150_v0 = vld [vmem:[%s137_s25] sm:$0xff] (%p29_p3)  ;;  %v152_v1 = vld [vmem:[%s137_s25 + $0x8] sm:$0xff] (%p29_p3) }
  0x10   : > { %v154_v2 = vld [vmem:[%s137_s25 + $0x20] sm:$0xff] (%p29_p3)  ;;  %151 = vst [vmem:[%s134_s26] sm:$0xff] (%p29_p3), %v150_v0  ;;  %153 = vst [vmem:[%s134_s26 + $0x8] sm:$0xff] (%p29_p3), %v152_v1  ;;  %v156_v3 = vld [vmem:[%s137_s25 + $0x28] sm:$0xff] (%p29_p3) }
  0x11   : > { %155 = vst [vmem:[%s134_s26 + $0x10] sm:$0xff] %v154_v2  ;;  %157 = vst [vmem:[%s134_s26 + $0x18] sm:$0xff] %v156_v3 }
  0x12 PF: > { %p365_p5 = scmp.ge.s32.totalorder %s424_s14, 1  ;;  %p162_p6 = scmp.lt.s32.totalorder %s424_s14, 3 }
  0x14   : > { %p163_p7 = pnand %p365_p5, %p162_p6 }
  0x15   : > { %s169_s27 = sand.u32 (!%p163_p7), 1, %s416_s12   ;;  %s367_s7 = sshll.u32 (!%p163_p7), %s358_s15, 1 }
  0x16   : > { %166 = sbr.rel (%p163_p7) target bundleno = 233 (0xe9), region = 51  ;;  %s366_s28 = sshll.u32 (!%p163_p7), %s169_s27, 5 }
  0x17   : > { %s171_s4 = scalar_lea.vmem (!%p163_p7), [#allocation2], %s366_s28  ;;  %p194_p8 = scmp.lt.s32.totalorder (!%p163_p7), %s367_s7, 3 }
  0x1b   : > { %vm214_vm0 = vcmask 1040384   ;;  %v426_v4 = vmov 0.0   ;;  %v427_v5 = vmov 0   ;;  %v204_v6 = vld [vmem:[%s508_s2] sm:$0xff]  ;;  %v202_v7 = vld [vmem:[%s171_s4 + $0x18] sm:$0x1] }
  0x1c   : > { %285 = vmatprep.mubr.f32.mxu0 %v426_v4  ;;  %401 = vset.pattern.permute.xlu0 %v427_v5  ;;  %v201_v8 = vld [vmem:[%s171_s4 + $0x10] sm:$0x1]  ;;  %v200_v9 = vld [vmem:[%s171_s4 + $0x8] sm:$0xff]  ;;  %v199_v10 = vld [vmem:[%s171_s4] sm:$0xff]  ;;  %vm210_vm1 = vcmask 72704   ;;  %s514_s7 = smov (!%p194_p8, %s367_s7), 3 }
  0x1d   : > { %207 = vperm.xlu0 %401, %v204_v6   ;;  %369 = vmatprep.subr.msk.mxu0 %vm214_vm0, %v202_v7  ;;  %v203_v11 = vld [vmem:[%s507_s1] sm:$0xff]  ;;  %s368_s8 = sshll.u32 %s514_s7, 3 }
  0x1e   : > { %370 = vmatpush1.msk.msra.mxu0 %vm214_vm0, %v201_v8  ;;  %s197_s11 = scalar_lea.vmem %s509_s3, %s368_s8 }
  0x1f   : > { %251 = vmatprep.subr.mxu0 %v200_v9 }
  0x20   : > { %252 = vmatpush1.msra.mxu0 %v199_v10 }
  0x21   : > { %371 = vmatmul.mubr.msk.f32.vlgmr.msra.gmra.mxu0 %vm210_vm1, %v203_v11 }
  0x98   : > { %v208_v12 = vpop.permute.xlu0 %207 }
  0xe1   : > { %v287_v13 = vpop.f32.mrf.mxu0 }
  0xe2   : > { %v288_v14 = vadd.f32 %v287_v13, %v208_v12 }
  0xe3   : > { %v289_v15 = vpop.f32.mrf.mxu0 }
  0xe4   : > { %v292_v16 = vmax.f32 %v288_v14, 0.0  ;;  %v290_v17 = vadd.f32 %v289_v15, %v208_v12 }
  0xe6   : > { %294 = vst [vmem:[%s197_s11] sm:$0xff] %v292_v16  ;;  %v293_v18 = vmax.f32 %v290_v17, 0.0 }
  0xe8   : > { %295 = vst [vmem:[%s197_s11 + $0x8] sm:$0xff] %v293_v18 }
  0xe9 PF: > { %p10_p9 = scmp.ge.s32.totalorder %s465_s16, 4   ;;  %s510_s12 = smov %s420_s13 }
  0xea   : > { %s511_s13 = smov %s474_s19  ;;  %s512_s14 = smov %s465_s16 }
  0xeb   :  { %12 = sbr.rel (!%p10_p9) target bundleno = 2 (0x2), region = 90 }

// kernel: denoiser_forward.8
= control target key start
LH: loop header
LB: loop body
LE: loop exit
PB: predicated region body
PF: predicated region fallthrough
CT: control target
= control target key end

     0   :  { %v146_v0 = vmov 0.0   ;;  %vm147_vm0 = vmmov 0   ;;  %v148_v3 = vmov 0   ;;  %vm30_vm1 = vcmask 588800   ;;  %s205_s0 = inlined_call_operand.vmem [shape: f32[72,128], index: 0, kind: input, shape index: {}]   ;;  %s206_s2 = inlined_call_operand.vmem [shape: f32[8,1], index: 2, kind: input, shape index: {}]   ;;  %s207_s1 = inlined_call_operand.vmem [shape: f32[8,72], index: 1, kind: input, shape index: {}]   ;;  %s208_s3 = inlined_call_operand.vmem [shape: f32[8,128], index: 3, kind: output, shape index: {}]  }
   0x1   :  { %121 = vmatprep.subr.mxu0 %v146_v0  ;;  %v22_v1 = vld [vmem:[%s205_s0 + $0x40] sm:$0xff]  ;;  %v21_v2 = vld [vmem:[%s205_s0 + $0x38] sm:$0xff]  ;;  %139 = vmatprep.mubr.msk.f32.mxu0 %vm147_vm0, %v146_v0  ;;  %v20_v4 = vld [vmem:[%s205_s0 + $0x30] sm:$0xff] }
   0x2   :  { %122 = vmatpush3.msra.mxu0 %v22_v1  ;;  %145 = vset.pattern.permute.xlu0 %v148_v3  ;;  %v24_v5 = vld [vmem:[%s206_s2] sm:$0xff]  ;;  %v19_v6 = vld [vmem:[%s205_s0 + $0x28] sm:$0xff]  ;;  %v17_v8 = vld [vmem:[%s205_s0 + $0x18] sm:$0xff] }
   0x3   :  { %123 = vmatprep.subr.mxu0 %v146_v0  ;;  %27 = vperm.xlu0 %145, %v24_v5   ;;  %v18_v7 = vld [vmem:[%s205_s0 + $0x20] sm:$0xff]  ;;  %v16_v9 = vld [vmem:[%s205_s0 + $0x10] sm:$0xff]  ;;  %v15_v10 = vld [vmem:[%s205_s0 + $0x8] sm:$0xff] }
   0x4   :  { %124 = vmatpush3.msra.mxu0 %v21_v2  ;;  %v14_v11 = vld [vmem:[%s205_s0] sm:$0xff] }
   0x5   :  { %125 = vmatprep.subr.mxu0 %v146_v0  ;;  %v23_v12 = vld [vmem:[%s207_s1] sm:$0xff] }
   0x6   :  { %126 = vmatpush3.msra.mxu0 %v20_v4 }
   0x7   :  { %127 = vmatprep.subr.mxu0 %v146_v0 }
   0x8   :  { %128 = vmatpush3.msra.mxu0 %v19_v6 }
   0x9   :  { %129 = vmatprep.subr.mxu0 %v146_v0 }
   0xa   :  { %130 = vmatpush3.msra.mxu0 %v18_v7 }
   0xb   :  { %131 = vmatprep.subr.mxu0 %v146_v0 }
   0xc   :  { %132 = vmatpush3.msra.mxu0 %v17_v8 }
   0xd   :  { %133 = vmatprep.subr.mxu0 %v146_v0 }
   0xe   :  { %134 = vmatpush3.msra.mxu0 %v16_v9 }
   0xf   :  { %135 = vmatprep.subr.mxu0 %v146_v0 }
  0x10   :  { %136 = vmatpush3.msra.mxu0 %v15_v10 }
  0x11   :  { %137 = vmatprep.subr.mxu0 %v146_v0 }
  0x12   :  { %138 = vmatpush3.msra.mxu0 %v14_v11 }
  0x13   :  { %140 = vmatmul.mubr.msk.f32.vlgmr.msra.gmra.mxu0 %vm30_vm1, %v23_v12 }
  0x7e   :  { %v28_v13 = vpop.permute.xlu0 %27 }
  0xd3   :  { %v100_v14 = vpop.f32.mrf.mxu0 }
  0xd4   :  { %v101_v15 = vadd.f32 %v100_v14, %v28_v13 }
  0xd5   :  { %v141_v16 = vpop.f32.mrf.mxu0 }
  0xd6   :  { %v104_v17 = vmax.f32 %v101_v15, 0.0 }
  0xd8   :  { %105 = vst [vmem:[%s208_s3] sm:$0xff] %v104_v17 }

// kernel: denoiser_forward.9
= control target key start
LH: loop header
LB: loop body
LE: loop exit
PB: predicated region body
PF: predicated region fallthrough
CT: control target
= control target key end

     0   :  { %v147_v0 = vmov 0.0   ;;  %vm148_vm0 = vmmov 0   ;;  %v149_v3 = vmov 0   ;;  %vm30_vm1 = vcmask 588800   ;;  %s206_s0 = inlined_call_operand.vmem [shape: f32[72,32], index: 0, kind: input, shape index: {}]   ;;  %s207_s2 = inlined_call_operand.vmem [shape: f32[8,1], index: 2, kind: input, shape index: {}]   ;;  %s208_s1 = inlined_call_operand.vmem [shape: f32[8,72], index: 1, kind: input, shape index: {}]   ;;  %s209_s3 = inlined_call_operand.vmem [shape: f32[8,32], index: 3, kind: output, shape index: {}]  }
   0x1   :  { %122 = vmatprep.subr.mxu0 %v147_v0  ;;  %v22_v1 = vld [vmem:[%s206_s0 + $0x40] sm:$0xff]  ;;  %v21_v2 = vld [vmem:[%s206_s0 + $0x38] sm:$0xff]  ;;  %140 = vmatprep.mubr.msk.f32.mxu0 %vm148_vm0, %v147_v0  ;;  %v20_v4 = vld [vmem:[%s206_s0 + $0x30] sm:$0xff]  ;;  %vm105_vm2 = vcmask 261120  }
   0x2   :  { %123 = vmatpush3.msra.mxu0 %v22_v1  ;;  %146 = vset.pattern.permute.xlu0 %v149_v3  ;;  %v24_v5 = vld [vmem:[%s207_s2] sm:$0xff]  ;;  %v19_v6 = vld [vmem:[%s206_s0 + $0x28] sm:$0xff]  ;;  %v17_v8 = vld [vmem:[%s206_s0 + $0x18] sm:$0xff] }
   0x3   :  { %124 = vmatprep.subr.mxu0 %v147_v0  ;;  %27 = vperm.xlu0 %146, %v24_v5   ;;  %v18_v7 = vld [vmem:[%s206_s0 + $0x20] sm:$0xff]  ;;  %v16_v9 = vld [vmem:[%s206_s0 + $0x10] sm:$0xff]  ;;  %v15_v10 = vld [vmem:[%s206_s0 + $0x8] sm:$0xff] }
   0x4   :  { %125 = vmatpush3.msra.mxu0 %v21_v2  ;;  %v14_v11 = vld [vmem:[%s206_s0] sm:$0xff] }
   0x5   :  { %126 = vmatprep.subr.mxu0 %v147_v0  ;;  %v23_v12 = vld [vmem:[%s208_s1] sm:$0xff] }
   0x6   :  { %127 = vmatpush3.msra.mxu0 %v20_v4 }
   0x7   :  { %128 = vmatprep.subr.mxu0 %v147_v0 }
   0x8   :  { %129 = vmatpush3.msra.mxu0 %v19_v6 }
   0x9   :  { %130 = vmatprep.subr.mxu0 %v147_v0 }
   0xa   :  { %131 = vmatpush3.msra.mxu0 %v18_v7 }
   0xb   :  { %132 = vmatprep.subr.mxu0 %v147_v0 }
   0xc   :  { %133 = vmatpush3.msra.mxu0 %v17_v8 }
   0xd   :  { %134 = vmatprep.subr.mxu0 %v147_v0 }
   0xe   :  { %135 = vmatpush3.msra.mxu0 %v16_v9 }
   0xf   :  { %136 = vmatprep.subr.mxu0 %v147_v0 }
  0x10   :  { %137 = vmatpush3.msra.mxu0 %v15_v10 }
  0x11   :  { %138 = vmatprep.subr.mxu0 %v147_v0 }
  0x12   :  { %139 = vmatpush3.msra.mxu0 %v14_v11 }
  0x13   :  { %141 = vmatmul.mubr.msk.f32.vlgmr.msra.gmra.mxu0 %vm30_vm1, %v23_v12 }
  0x7e   :  { %v28_v13 = vpop.permute.xlu0 %27 }
  0xd3   :  { %v100_v14 = vpop.f32.mrf.mxu0 }
  0xd4   :  { %v101_v15 = vadd.f32 %v100_v14, %v28_v13 }
  0xd5   :  { %v142_v16 = vpop.f32.mrf.mxu0 }
  0xd6   :  { %v104_v17 = vmax.f32 %v101_v15, 0.0 }
  0xd8   :  { %106 = vst.msk [vmem:[%s209_s3] sm:$0xff] %vm105_vm2, %v104_v17 }

// kernel: denoiser_forward.10
= control target key start
LH: loop header
LB: loop body
LE: loop exit
PB: predicated region body
PF: predicated region fallthrough
CT: control target
= control target key end

     0   :  { %v147_v0 = vmov 0.0   ;;  %vm148_vm0 = vmmov 0   ;;  %v149_v3 = vmov 0   ;;  %vm30_vm1 = vcmask 588800   ;;  %s206_s0 = inlined_call_operand.vmem [shape: f32[72,8], index: 0, kind: input, shape index: {}]   ;;  %s207_s2 = inlined_call_operand.vmem [shape: f32[8,1], index: 2, kind: input, shape index: {}]   ;;  %s208_s1 = inlined_call_operand.vmem [shape: f32[8,72], index: 1, kind: input, shape index: {}]   ;;  %s209_s3 = inlined_call_operand.vmem [shape: f32[8,8], index: 3, kind: output, shape index: {}]  }
   0x1   :  { %122 = vmatprep.subr.mxu0 %v147_v0  ;;  %v22_v1 = vld [vmem:[%s206_s0 + $0x40] sm:$0xff]  ;;  %v21_v2 = vld [vmem:[%s206_s0 + $0x38] sm:$0xff]  ;;  %140 = vmatprep.mubr.msk.f32.mxu0 %vm148_vm0, %v147_v0  ;;  %v20_v4 = vld [vmem:[%s206_s0 + $0x30] sm:$0xff]  ;;  %vm105_vm2 = vcmask 64512  }
   0x2   :  { %123 = vmatpush3.msra.mxu0 %v22_v1  ;;  %146 = vset.pattern.permute.xlu0 %v149_v3  ;;  %v24_v5 = vld [vmem:[%s207_s2] sm:$0xff]  ;;  %v19_v6 = vld [vmem:[%s206_s0 + $0x28] sm:$0xff]  ;;  %v17_v8 = vld [vmem:[%s206_s0 + $0x18] sm:$0xff] }
   0x3   :  { %124 = vmatprep.subr.mxu0 %v147_v0  ;;  %27 = vperm.xlu0 %146, %v24_v5   ;;  %v18_v7 = vld [vmem:[%s206_s0 + $0x20] sm:$0xff]  ;;  %v16_v9 = vld [vmem:[%s206_s0 + $0x10] sm:$0xff]  ;;  %v15_v10 = vld [vmem:[%s206_s0 + $0x8] sm:$0xff] }
   0x4   :  { %125 = vmatpush3.msra.mxu0 %v21_v2  ;;  %v14_v11 = vld [vmem:[%s206_s0] sm:$0xff] }
   0x5   :  { %126 = vmatprep.subr.mxu0 %v147_v0  ;;  %v23_v12 = vld [vmem:[%s208_s1] sm:$0xff] }
   0x6   :  { %127 = vmatpush3.msra.mxu0 %v20_v4 }
   0x7   :  { %128 = vmatprep.subr.mxu0 %v147_v0 }
   0x8   :  { %129 = vmatpush3.msra.mxu0 %v19_v6 }
   0x9   :  { %130 = vmatprep.subr.mxu0 %v147_v0 }
   0xa   :  { %131 = vmatpush3.msra.mxu0 %v18_v7 }
   0xb   :  { %132 = vmatprep.subr.mxu0 %v147_v0 }
   0xc   :  { %133 = vmatpush3.msra.mxu0 %v17_v8 }
   0xd   :  { %134 = vmatprep.subr.mxu0 %v147_v0 }
   0xe   :  { %135 = vmatpush3.msra.mxu0 %v16_v9 }
   0xf   :  { %136 = vmatprep.subr.mxu0 %v147_v0 }
  0x10   :  { %137 = vmatpush3.msra.mxu0 %v15_v10 }
  0x11   :  { %138 = vmatprep.subr.mxu0 %v147_v0 }
  0x12   :  { %139 = vmatpush3.msra.mxu0 %v14_v11 }
  0x13   :  { %141 = vmatmul.mubr.msk.f32.vlgmr.msra.gmra.mxu0 %vm30_vm1, %v23_v12 }
  0x7e   :  { %v28_v13 = vpop.permute.xlu0 %27 }
  0xd3   :  { %v100_v14 = vpop.f32.mrf.mxu0 }
  0xd4   :  { %v101_v15 = vadd.f32 %v100_v14, %v28_v13 }
  0xd5   :  { %v142_v16 = vpop.f32.mrf.mxu0 }
  0xd6   :  { %v104_v17 = vmax.f32 %v101_v15, 0.0 }
  0xd8   :  { %106 = vst.msk [vmem:[%s209_s3] sm:$0xff] %vm105_vm2, %v104_v17 }

// kernel: denoiser_forward.11
= control target key start
LH: loop header
LB: loop body
LE: loop exit
PB: predicated region body
PF: predicated region fallthrough
CT: control target
= control target key end

     0   :  { %v1779_v0 = vmov 0.0   ;;  %vm1780_vm0 = vmmov 0   ;;  %vm33_vm1 = vcmask 64512   ;;  %vm110_vm2 = vcmask 15360   ;;  %s1783_s23 = smov 118   ;;  %s1784_s24 = smov 126   ;;  %s1996_s1 = inlined_call_operand.vmem [shape: f32[8,24], index: 1, kind: input, shape index: {}]   ;;  %s1997_s0 = inlined_call_operand.vmem [shape: f32[2,4,8], index: 0, kind: input, shape index: {}]   ;;  %s1998_s2 = inlined_call_operand.vmem [shape: f32[1,24], index: 2, kind: input, shape index: {}]   ;;  %s1999_s3 = inlined_call_operand.vmem [shape: f32[8,8], index: 3, kind: input, shape index: {}]   ;;  %s2000_s4 = inlined_call_operand.vmem [shape: f32[1,8], index: 4, kind: input, shape index: {}]   ;;  %s2001_s5 = inlined_call_operand.vmem [shape: f32[2,4,8], index: 5, kind: output, shape index: {}]  }
   0x1   :  { %1640 = vmatprep.subr.mxu0 %v1779_v0  ;;  %v22_v1 = vld [vmem:[%s1996_s1] sm:$0xff]  ;;  %1642 = vmatprep.mubr.msk.f32.mxu0 %vm1780_vm0, %v1779_v0  ;;  %vm263_vm3 = vcmask 27648   ;;  %vm292_vm4 = vcmask 1043456   ;;  %vm288_vm5 = vcmask 31744   ;;  %s1785_s25 = smov 110   ;;  %s1786_s26 = smov 116  }
   0x2   :  { %1641 = vmatpush3.msra.mxu0 %v22_v1  ;;  %v1746_v2 = vld [vmem:[%s1997_s0] sm:$0xff]   ;;  %1645 = vmatprep.subr.mxu1 %v1779_v0  ;;  %s1781_s0 = smov 120   ;;  %s1787_s27 = smov 124   ;;  %vm1472_vm6 = vcmask 48128   ;;  %vm1561_vm7 = vcmask 60416  }
   0x3   :  { %1647 = vmatprep.mubr.msk.f32.mxu1 %vm1780_vm0, %v1779_v0  ;;  %1650 = vmatprep.subr.mxu0 %v1779_v0  ;;  %v1568_v3 = vld [vmem:[%s1998_s2] ss:$0 sm:$0xff]  ;;  %s1782_s2 = smov 112   ;;  %s1788_s28 = smov 108  }
   0x4   :  { %1643 = vmatmul.mubr.msk.f32.vlgmr.msra.gmra.mxu0 %vm33_vm1, %v1746_v2  ;;  %s1789_s29 = smov 114   ;;  %s1790_s30 = smov 122  }
   0x5   :  { %1652 = vmatprep.mubr.msk.f32.mxu0 %vm1780_vm0, %v1779_v0  ;;  %s1791_s6 = smov 106   ;;  %s1792_s7 = smov 2  }
   0x6   :  { %s1793_s8 = smov 4   ;;  %s1794_s11 = smov 6  }
  0xc4   :  { %v102_v4 = vpop.f32.mrf.mxu0 }
  0xc5   :  { %v1844_v5 = vadd.f32 %v1568_v3, %v102_v4 }
  0xc6   :  { %v1644_v6 = vpop.f32.mrf.mxu0 }
  0xc7   :  { %108 = vrot.lane.b32.xlu0 %v1844_v5, %s1781_s0  ;;  %v1849_v7 = vcombine.high %v1844_v5, %v1844_v5 }
  0xcb   :  { %185 = vrot.lane.b32.xlu0 %v1849_v7, %s1781_s0 }
 0x139   :  { %v109_v8 = vpop.permute.xlu0 %108 }
 0x13a   :  { %1646 = vmatpush3.xpose.msk.msra.mxu1 %vm110_vm2, %v109_v8 }
 0x13b   :  { %1655 = vmatprep.subr.mxu1 %v1779_v0 }
 0x13d   :  { %1648 = vmatmul.mubr.msk.f32.vlgmr.msra.gmra.mxu1 %vm110_vm2, %v1844_v5  ;;  %v186_v9 = vpop.permute.xlu0 %185 }
 0x13e   :  { %1651 = vmatpush3.xpose.msk.msra.mxu0 %vm110_vm2, %v186_v9  ;;  %1657 = vmatprep.mubr.msk.f32.mxu1 %vm1780_vm0, %v1779_v0 }
 0x13f   :  { %1660 = vmatprep.subr.mxu0 %v1779_v0 }
 0x141   :  { %1653 = vmatmul.mubr.msk.f32.vlgmr.msra.gmra.mxu0 %vm110_vm2, %v1849_v7 }
 0x142   :  { %1662 = vmatprep.mubr.msk.f32.mxu0 %vm1780_vm0, %v1779_v0 }
 0x1fd   :  { %v181_v10 = vpop.f32.mrf.mxu1 }
 0x1fe   :  { %v261_v11 = vmul.f32 0.70710677, %v181_v10 }
 0x1ff   :  { %v1649_v12 = vpop.f32.mrf.mxu1 }
 0x200   :  { %v264_v13 = vsel %vm263_vm3, %v261_v11, -inf }
 0x201   :  { %265 = vmax.xlane.f32.xlu1 %v264_v13  ;;  %v257_v14 = vpop.f32.mrf.mxu0 }
 0x202   :  { %v262_v15 = vmul.f32 0.70710677, %v257_v14 }
 0x203   :  { %v1654_v16 = vpop.f32.mrf.mxu0 }
 0x204   :  { %v267_v17 = vsel %vm263_vm3, %v262_v15, -inf }
 0x205   :  { %268 = vmax.xlane.f32.xlu1 %v267_v17 }
 0x216   :  { %286 = vrot.lane.b32.xlu1 %v1844_v5, %s1782_s2 }
 0x21a   :  { %365 = vrot.lane.b32.xlu1 %v1849_v7, %s1782_s2 }
 0x21e   :  { %444 = vrot.lane.b32.xlu1 %v1844_v5, %s1783_s23 }
 0x222   :  { %522 = vrot.lane.b32.xlu1 %v1849_v7, %s1783_s23 }
 0x28a   :  { %v266_v18 = vpop.xlane.xlu1 %265 }
 0x28b   :  { %v270_v19 = vsub.f32 %v261_v11, %v266_v18 }
 0x28d   :  { %v272_v20 = vmul.f32 1.442695, %v270_v19 }
 0x28e   :  { %v269_v21 = vpop.xlane.xlu1 %268 }
 0x28f   :  { %1747 = vpow2.f32 %v272_v20  ;;  %v271_v22 = vsub.f32 %v262_v15, %v269_v21 }
 0x291   :  { %v274_v23 = vmul.f32 1.442695, %v271_v22 }
 0x292   :  { %v287_v24 = vpop.permute.xlu1 %286 }
 0x293   :  { %1749 = vpow2.f32 %v274_v23  ;;  %1656 = vmatpush3.msk.msra.mxu1 %vm292_vm4, %v287_v24 }
 0x294   :  { %1665 = vmatprep.subr.mxu1 %v1779_v0 }
 0x296   :  { %v366_v25 = vpop.permute.xlu1 %365 }
 0x297   :  { %1661 = vmatpush3.msk.msra.mxu0 %vm292_vm4, %v366_v25 }
 0x298   :  { %1670 = vmatprep.subr.mxu0 %v1779_v0 }
 0x29a   :  { %v445_v30 = vpop.permute.xlu1 %444 }
 0x29c   :  { %v1748_v26 = vpop.eup %1747 }
 0x29d   :  { %v276_v27 = vsel %vm263_vm3, %v1748_v26, 0.0 }
 0x29e   :  { %277 = vadd.xlane.f32.xlu0 %v276_v27  ;;  %v523_v31 = vpop.permute.xlu1 %522 }
 0x2a0   :  { %v1750_v28 = vpop.eup %1749 }
 0x2a1   :  { %v279_v29 = vsel %vm263_vm3, %v1750_v28, 0.0 }
 0x2a2   :  { %280 = vadd.xlane.f32.xlu1 %v279_v29 }
 0x2b3   :  { %520 = vrot.lane.b32.xlu1 %v1849_v7, %s1784_s24 }
 0x2b4   :  { %442 = vrot.lane.b32.xlu0 %v1844_v5, %s1784_s24 }
 0x327   :  { %v278_v32 = vpop.xlane.xlu0 %277 }
 0x328   :  { %1751 = vrcp.f32 %v278_v32 }
 0x32b   :  { %v281_v33 = vpop.xlane.xlu1 %280  ;;  %v443_v38 = vpop.permute.xlu0 %442 }
 0x32c   :  { %1753 = vrcp.f32 %v281_v33 }
 0x32f   :  { %v521_v39 = vpop.permute.xlu1 %520 }
 0x335   :  { %v1752_v34 = vpop.eup %1751 }
 0x336   :  { %v284_v35 = vmul.f32 %v1752_v34, %v1748_v26 }
 0x338   :  { %1658 = vmatmul.mubr.msk.f32.vlgmr.msra.gmra.mxu1 %vm288_vm5, %v284_v35 }
 0x339   :  { %v1754_v36 = vpop.eup %1753  ;;  %1666 = vmatpush3.xpose.msk.msra.mxu1 %vm110_vm2, %v445_v30  ;;  %1667 = vmatprep.mubr.msk.f32.mxu1 %vm1780_vm0, %v1779_v0 }
 0x33a   :  { %v285_v37 = vmul.f32 %v1754_v36, %v1750_v28  ;;  %1675 = vmatprep.subr.mxu1 %v1779_v0 }
 0x33c   :  { %1663 = vmatmul.mubr.msk.f32.vlgmr.msra.gmra.mxu0 %vm288_vm5, %v285_v37  ;;  %1668 = vmatmul.mubr.msk.f32.vlgmr.msra.gmra.mxu1 %vm110_vm2, %v443_v38 }
 0x33d   :  { %1671 = vmatpush3.xpose.msk.msra.mxu0 %vm110_vm2, %v523_v31  ;;  %1672 = vmatprep.mubr.msk.f32.mxu0 %vm1780_vm0, %v1779_v0 }
 0x33e   :  { %1680 = vmatprep.subr.mxu0 %v1779_v0  ;;  %1677 = vmatprep.mubr.msk.f32.mxu1 %vm1780_vm0, %v1779_v0 }
 0x340   :  { %1673 = vmatmul.mubr.msk.f32.vlgmr.msra.gmra.mxu0 %vm110_vm2, %v521_v39 }
 0x341   :  { %1682 = vmatprep.mubr.msk.f32.mxu0 %vm1780_vm0, %v1779_v0 }
 0x3f8   :  { %v1894_v40 = vpop.f32.mrf.mxu1 }
 0x3fa   :  { %v1659_v41 = vpop.f32.mrf.mxu1 }
 0x3fc   :  { %v1896_v42 = vpop.f32.mrf.mxu0  ;;  %v516_v43 = vpop.f32.mrf.mxu1 }
 0x3fd   :  { %v598_v44 = vmul.f32 0.70710677, %v516_v43 }
 0x3fe   :  { %v1664_v45 = vpop.f32.mrf.mxu0  ;;  %v1669_v46 = vpop.f32.mrf.mxu1 }
 0x3ff   :  { %v600_v47 = vsel %vm263_vm3, %v598_v44, -inf }
 0x400   :  { %601 = vmax.xlane.f32.xlu1 %v600_v47  ;;  %v594_v48 = vpop.f32.mrf.mxu0 }
 0x401   :  { %v599_v49 = vmul.f32 0.70710677, %v594_v48 }
 0x402   :  { %v1674_v50 = vpop.f32.mrf.mxu0 }
 0x403   :  { %v603_v51 = vsel %vm263_vm3, %v599_v49, -inf }
 0x404   :  { %604 = vmax.xlane.f32.xlu0 %v603_v51 }
 0x411   :  { %622 = vrot.lane.b32.xlu1 %v1844_v5, %s1785_s25 }
 0x415   :  { %778 = vrot.lane.b32.xlu1 %v1844_v5, %s1786_s26 }
 0x419   :  { %856 = vrot.lane.b32.xlu1 %v1849_v7, %s1786_s26 }
 0x41a   :  { %699 = vrot.lane.b32.xlu0 %v1849_v7, %s1785_s25 }
 0x41e   :  { %776 = vrot.lane.b32.xlu0 %v1844_v5, %s1787_s27 }
 0x489   :  { %v602_v52 = vpop.xlane.xlu1 %601 }
 0x48a   :  { %v606_v53 = vsub.f32 %v598_v44, %v602_v52 }
 0x48c   :  { %v608_v54 = vmul.f32 1.442695, %v606_v53 }
 0x48d   :  { %v623_v55 = vpop.permute.xlu1 %622  ;;  %v605_v56 = vpop.xlane.xlu0 %604 }
 0x48e   :  { %1755 = vpow2.f32 %v608_v54  ;;  %v607_v57 = vsub.f32 %v599_v49, %v605_v56  ;;  %1676 = vmatpush3.msk.msra.mxu1 %vm292_vm4, %v623_v55 }
 0x48f   :  { %1685 = vmatprep.subr.mxu1 %v1779_v0 }
 0x490   :  { %v610_v58 = vmul.f32 1.442695, %v607_v57 }
 0x491   :  { %v700_v59 = vpop.permute.xlu0 %699  ;;  %v779_v1 = vpop.permute.xlu1 %778 }
 0x492   :  { %1757 = vpow2.f32 %v610_v58  ;;  %1681 = vmatpush3.msk.msra.mxu0 %vm292_vm4, %v700_v59 }
 0x493   :  { %1690 = vmatprep.subr.mxu0 %v1779_v0 }
 0x495   :  { %v857_v2 = vpop.permute.xlu1 %856  ;;  %v777_v11 = vpop.permute.xlu0 %776 }
 0x49b   :  { %v1756_v60 = vpop.eup %1755 }
 0x49c   :  { %v612_v61 = vsel %vm263_vm3, %v1756_v60, 0.0 }
 0x49d   :  { %613 = vadd.xlane.f32.xlu1 %v612_v61 }
 0x49f   :  { %v1758_v62 = vpop.eup %1757 }
 0x4a0   :  { %v615_v63 = vsel %vm263_vm3, %v1758_v62, 0.0 }
 0x4a1   :  { %616 = vadd.xlane.f32.xlu1 %v615_v63 }
 0x4b2   :  { %854 = vrot.lane.b32.xlu1 %v1849_v7, %s1787_s27 }
 0x526   :  { %v614_v3 = vpop.xlane.xlu1 %613 }
 0x527   :  { %1759 = vrcp.f32 %v614_v3 }
 0x52a   :  { %v617_v4 = vpop.xlane.xlu1 %616 }
 0x52b   :  { %1761 = vrcp.f32 %v617_v4 }
 0x52e   :  { %v855_v12 = vpop.permute.xlu1 %854 }
 0x534   :  { %v1760_v6 = vpop.eup %1759 }
 0x535   :  { %v620_v8 = vmul.f32 %v1760_v6, %v1756_v60 }
 0x537   :  { %1678 = vmatmul.mubr.msk.f32.vlgmr.msra.gmra.mxu1 %vm288_vm5, %v620_v8 }
 0x538   :  { %v1762_v9 = vpop.eup %1761  ;;  %1686 = vmatpush3.xpose.msk.msra.mxu1 %vm110_vm2, %v779_v1  ;;  %1687 = vmatprep.mubr.msk.f32.mxu1 %vm1780_vm0, %v1779_v0 }
 0x539   :  { %v621_v10 = vmul.f32 %v1762_v9, %v1758_v62  ;;  %1695 = vmatprep.subr.mxu1 %v1779_v0 }
 0x53b   :  { %1683 = vmatmul.mubr.msk.f32.vlgmr.msra.gmra.mxu0 %vm288_vm5, %v621_v10  ;;  %1688 = vmatmul.mubr.msk.f32.vlgmr.msra.gmra.mxu1 %vm110_vm2, %v777_v11 }
 0x53c   :  { %1691 = vmatpush3.xpose.msk.msra.mxu0 %vm110_vm2, %v857_v2  ;;  %1692 = vmatprep.mubr.msk.f32.mxu0 %vm1780_vm0, %v1779_v0 }
 0x53d   :  { %1700 = vmatprep.subr.mxu0 %v1779_v0  ;;  %1697 = vmatprep.mubr.msk.f32.mxu1 %vm1780_vm0, %v1779_v0 }
 0x53f   :  { %1693 = vmatmul.mubr.msk.f32.vlgmr.msra.gmra.mxu0 %vm110_vm2, %v855_v12 }
 0x540   :  { %1702 = vmatprep.mubr.msk.f32.mxu0 %vm1780_vm0, %v1779_v0 }
 0x5f7   :  { %v1928_v13 = vpop.f32.mrf.mxu1 }
 0x5f9   :  { %v1679_v14 = vpop.f32.mrf.mxu1 }
 0x5fb   :  { %v1930_v15 = vpop.f32.mrf.mxu0  ;;  %v850_v16 = vpop.f32.mrf.mxu1 }
 0x5fc   :  { %v932_v17 = vmul.f32 0.70710677, %v850_v16 }
 0x5fd   :  { %v1684_v18 = vpop.f32.mrf.mxu0  ;;  %v1689_v19 = vpop.f32.mrf.mxu1 }
 0x5fe   :  { %v934_v20 = vsel %vm263_vm3, %v932_v17, -inf }
 0x5ff   :  { %935 = vmax.xlane.f32.xlu0 %v934_v20  ;;  %v928_v21 = vpop.f32.mrf.mxu0 }
 0x600   :  { %v933_v22 = vmul.f32 0.70710677, %v928_v21 }
 0x601   :  { %v1694_v23 = vpop.f32.mrf.mxu0 }
 0x602   :  { %v937_v24 = vsel %vm263_vm3, %v933_v22, -inf }
 0x603   :  { %938 = vmax.xlane.f32.xlu1 %v937_v24 }
 0x614   :  { %956 = vrot.lane.b32.xlu1 %v1844_v5, %s1788_s28 }
 0x618   :  { %1112 = vrot.lane.b32.xlu1 %v1844_v5, %s1789_s29 }
 0x61c   :  { %1190 = vrot.lane.b32.xlu1 %v1849_v7, %s1789_s29 }
 0x620   :  { %1188 = vrot.lane.b32.xlu1 %v1849_v7, %s1790_s30 }
 0x688   :  { %v936_v25 = vpop.xlane.xlu0 %935 }
 0x689   :  { %v940_v26 = vsub.f32 %v932_v17, %v936_v25 }
 0x68b   :  { %v942_v27 = vmul.f32 1.442695, %v940_v26 }
 0x68c   :  { %v939_v28 = vpop.xlane.xlu1 %938 }
 0x68d   :  { %1763 = vpow2.f32 %v942_v27  ;;  %v941_v29 = vsub.f32 %v933_v22, %v939_v28 }
 0x68f   :  { %v944_v30 = vmul.f32 1.442695, %v941_v29 }
 0x690   :  { %v957_v31 = vpop.permute.xlu1 %956 }
 0x691   :  { %1765 = vpow2.f32 %v944_v30  ;;  %1696 = vmatpush3.msk.msra.mxu1 %vm292_vm4, %v957_v31 }
 0x692   :  { %1705 = vmatprep.subr.mxu1 %v1779_v0 }
 0x694   :  { %v1113_v39 = vpop.permute.xlu1 %1112 }
 0x698   :  { %v1191_v45 = vpop.permute.xlu1 %1190 }
 0x69a   :  { %v1764_v32 = vpop.eup %1763 }
 0x69b   :  { %v946_v33 = vsel %vm263_vm3, %v1764_v32, 0.0 }
 0x69c   :  { %947 = vadd.xlane.f32.xlu0 %v946_v33  ;;  %v1189_v48 = vpop.permute.xlu1 %1188  ;;  %v1602_v33 = vld [vmem:[%s2000_s4] ss:$0 sm:$0xff] }
 0x69e   :  { %v1766_v34 = vpop.eup %1765 }
 0x69f   :  { %v949_v35 = vsel %vm263_vm3, %v1766_v34, 0.0 }
 0x6a0   :  { %950 = vadd.xlane.f32.xlu0 %v949_v35 }
 0x6b6   :  { %1033 = vrot.lane.b32.xlu0 %v1849_v7, %s1788_s28 }
 0x6ba   :  { %1110 = vrot.lane.b32.xlu0 %v1844_v5, %s1790_s30 }
 0x725   :  { %v948_v36 = vpop.xlane.xlu0 %947 }
 0x726   :  { %1767 = vrcp.f32 %v948_v36 }
 0x729   :  { %v951_v37 = vpop.xlane.xlu0 %950 }
 0x72a   :  { %1769 = vrcp.f32 %v951_v37 }
 0x72d   :  { %v1034_v38 = vpop.permute.xlu0 %1033 }
 0x72e   :  { %1701 = vmatpush3.msk.msra.mxu0 %vm292_vm4, %v1034_v38 }
 0x72f   :  { %1710 = vmatprep.subr.mxu0 %v1779_v0 }
 0x731   :  { %v1111_v47 = vpop.permute.xlu0 %1110 }
 0x733   :  { %v1768_v41 = vpop.eup %1767 }
 0x734   :  { %v954_v43 = vmul.f32 %v1768_v41, %v1764_v32 }
 0x736   :  { %1698 = vmatmul.mubr.msk.f32.vlgmr.msra.gmra.mxu1 %vm288_vm5, %v954_v43 }
 0x737   :  { %v1770_v44 = vpop.eup %1769  ;;  %1706 = vmatpush3.xpose.msk.msra.mxu1 %vm110_vm2, %v1113_v39  ;;  %1707 = vmatprep.mubr.msk.f32.mxu1 %vm1780_vm0, %v1779_v0 }
 0x738   :  { %v955_v46 = vmul.f32 %v1770_v44, %v1766_v34  ;;  %1715 = vmatprep.subr.mxu1 %v1779_v0 }
 0x73a   :  { %1703 = vmatmul.mubr.msk.f32.vlgmr.msra.gmra.mxu0 %vm288_vm5, %v955_v46  ;;  %1708 = vmatmul.mubr.msk.f32.vlgmr.msra.gmra.mxu1 %vm110_vm2, %v1111_v47 }
 0x73b   :  { %1711 = vmatpush3.xpose.msk.msra.mxu0 %vm110_vm2, %v1191_v45  ;;  %1712 = vmatprep.mubr.msk.f32.mxu0 %vm1780_vm0, %v1779_v0 }
 0x73c   :  { %1720 = vmatprep.subr.mxu0 %v1779_v0  ;;  %1717 = vmatprep.mubr.msk.f32.mxu1 %vm1780_vm0, %v1779_v0 }
 0x73e   :  { %1713 = vmatmul.mubr.msk.f32.vlgmr.msra.gmra.mxu0 %vm110_vm2, %v1189_v48 }
 0x73f   :  { %1722 = vmatprep.mubr.msk.f32.mxu0 %vm1780_vm0, %v1779_v0 }
 0x7f6   :  { %v1029_v49 = vpop.f32.mrf.mxu1 }
 0x7f8   :  { %v1699_v50 = vpop.f32.mrf.mxu1 }
 0x7fa   :  { %v1106_v51 = vpop.f32.mrf.mxu0  ;;  %v1184_v52 = vpop.f32.mrf.mxu1 }
 0x7fb   :  { %v1266_v53 = vmul.f32 0.70710677, %v1184_v52 }
 0x7fc   :  { %v1704_v54 = vpop.f32.mrf.mxu0  ;;  %v1709_v55 = vpop.f32.mrf.mxu1 }
 0x7fd   :  { %v1268_v56 = vsel %vm263_vm3, %v1266_v53, -inf }
 0x7fe   :  { %1269 = vmax.xlane.f32.xlu0 %v1268_v56  ;;  %v1262_v57 = vpop.f32.mrf.mxu0 }
 0x7ff   :  { %v1267_v58 = vmul.f32 0.70710677, %v1262_v57 }
 0x800   :  { %v1714_v59 = vpop.f32.mrf.mxu0 }
 0x801   :  { %v1271_v60 = vsel %vm263_vm3, %v1267_v58, -inf }
 0x802   :  { %1272 = vmax.xlane.f32.xlu1 %v1271_v60 }
 0x813   :  { %1290 = vrot.lane.b32.xlu1 %v1844_v5, %s1791_s6 }
 0x817   :  { %1446 = vrot.lane.b32.xlu1 %v1928_v13, %s1792_s7 }
 0x81b   :  { %1448 = vrot.lane.b32.xlu1 %v1930_v15, %s1792_s7 }
 0x81f   :  { %1456 = vrot.lane.b32.xlu1 %v1106_v51, %s1793_s8 }
 0x887   :  { %v1270_v61 = vpop.xlane.xlu0 %1269 }
 0x888   :  { %v1274_v62 = vsub.f32 %v1266_v53, %v1270_v61 }
 0x88a   :  { %v1276_v63 = vmul.f32 1.442695, %v1274_v62 }
 0x88b   :  { %v1273_v1 = vpop.xlane.xlu1 %1272 }
 0x88c   :  { %1771 = vpow2.f32 %v1276_v63  ;;  %v1275_v2 = vsub.f32 %v1267_v58, %v1273_v1 }
 0x88e   :  { %v1278_v3 = vmul.f32 1.442695, %v1275_v2 }
 0x88f   :  { %v1291_v4 = vpop.permute.xlu1 %1290 }
 0x890   :  { %1773 = vpow2.f32 %v1278_v3  ;;  %1716 = vmatpush3.msk.msra.mxu1 %vm292_vm4, %v1291_v4 }
 0x891   :  { %1725 = vmatprep.subr.mxu1 %v1779_v0 }
 0x893   :  { %v1447_v21 = vpop.permute.xlu1 %1446 }
 0x894   :  { %v1468_v25 = vsel %vm110_vm2, %v1894_v40, %v1447_v21 }
 0x897   :  { %v1449_v22 = vpop.permute.xlu1 %1448 }
 0x898   :  { %v1469_v26 = vsel %vm110_vm2, %v1896_v42, %v1449_v22 }
 0x899   :  { %v1772_v5 = vpop.eup %1771 }
 0x89a   :  { %v1280_v6 = vsel %vm263_vm3, %v1772_v5, 0.0 }
 0x89b   :  { %1281 = vadd.xlane.f32.xlu0 %v1280_v6  ;;  %v1457_v24 = vpop.permute.xlu1 %1456 }
 0x89c   :  { %v1471_v27 = vsel %vm288_vm5, %v1469_v26, %v1457_v24 }
 0x89d   :  { %v1774_v8 = vpop.eup %1773 }
 0x89e   :  { %v1283_v9 = vsel %vm263_vm3, %v1774_v8, 0.0 }
 0x89f   :  { %1284 = vadd.xlane.f32.xlu0 %v1283_v9 }
 0x8b5   :  { %1367 = vrot.lane.b32.xlu0 %v1849_v7, %s1791_s6  ;;  %v1475_v7 = vld [vmem:[%s1999_s3] sm:$0xff] }
 0x8b9   :  { %1454 = vrot.lane.b32.xlu0 %v1029_v49, %s1793_s8 }
 0x924   :  { %v1282_v10 = vpop.xlane.xlu0 %1281 }
 0x925   :  { %1775 = vrcp.f32 %v1282_v10 }
 0x928   :  { %v1285_v11 = vpop.xlane.xlu0 %1284 }
 0x929   :  { %1777 = vrcp.f32 %v1285_v11 }
 0x92c   :  { %v1368_v12 = vpop.permute.xlu0 %1367 }
 0x92d   :  { %1721 = vmatpush3.msk.msra.mxu0 %vm292_vm4, %v1368_v12 }
 0x930   :  { %v1455_v23 = vpop.permute.xlu0 %1454 }
 0x931   :  { %v1470_v28 = vsel %vm288_vm5, %v1468_v25, %v1455_v23 }
 0x932   :  { %v1776_v13 = vpop.eup %1775 }
 0x933   :  { %v1288_v14 = vmul.f32 %v1776_v13, %v1772_v5 }
 0x935   :  { %1718 = vmatmul.mubr.msk.f32.vlgmr.msra.gmra.mxu1 %vm288_vm5, %v1288_v14 }
 0x936   :  { %v1778_v15 = vpop.eup %1777  ;;  %1727 = vmatprep.mubr.msk.f32.mxu1 %vm1780_vm0, %v1779_v0  ;;  %1726 = vmatpush3.msra.mxu1 %v1475_v7 }
 0x937   :  { %v1289_v16 = vmul.f32 %v1778_v15, %v1774_v8 }
 0x939   :  { %1723 = vmatmul.mubr.msk.f32.vlgmr.msra.gmra.mxu0 %vm288_vm5, %v1289_v16 }
 0x9f5   :  { %v1363_v17 = vpop.f32.mrf.mxu1 }
 0x9f6   :  { %1462 = vrot.lane.b32.xlu0 %v1363_v17, %s1794_s11 }
 0x9f7   :  { %v1719_v18 = vpop.f32.mrf.mxu1 }
 0x9f9   :  { %v1440_v19 = vpop.f32.mrf.mxu0 }
 0x9fa   :  { %1464 = vrot.lane.b32.xlu1 %v1440_v19, %s1794_s11 }
 0x9fb   :  { %v1724_v20 = vpop.f32.mrf.mxu0 }
 0xa68   :  { %v1463_v0 = vpop.permute.xlu0 %1462 }
 0xa69   :  { %v1473_v30 = vsel %vm1472_vm6, %v1470_v28, %v1463_v0 }
 0xa6c   :  { %v1465_v29 = vpop.permute.xlu1 %1464 }
 0xa6d   :  { %v1474_v31 = vsel %vm1472_vm6, %v1471_v27, %v1465_v29 }
 0xa6e   :  { %v1485_v32 = vcombine.low %v1473_v30, %v1474_v31 }
 0xa70   :  { %1728 = vmatmul.mubr.msk.f32.vlgmr.msra.gmra.mxu1 %vm33_vm1, %v1485_v32 }
 0xb30   :  { %v1554_v34 = vpop.f32.mrf.mxu1 }
 0xb31   :  { %v1555_v40 = vadd.f32 %v1602_v33, %v1554_v34 }
 0xb32   :  { %v1729_v35 = vpop.f32.mrf.mxu1 }
 0xb33   :  { %v1559_v36 = vcombine.high %v1555_v40, %v1555_v40  ;;  %1562 = vst.msk [vmem:[%s2001_s5] sm:$0xf] %vm1561_vm7, %v1555_v40 }
 0xb35   :  { %1563 = vst.msk [vmem:[%s2001_s5 + $0x4] sm:$0xf] %vm1561_vm7, %v1559_v36 }

// kernel: denoiser_forward.12
= control target key start
LH: loop header
LB: loop body
LE: loop exit
PB: predicated region body
PF: predicated region fallthrough
CT: control target
= control target key end

     0   :  { %s597_s0 = inlined_call_operand.vmem [shape: f32[72,512], index: 0, kind: input, shape index: {}]   ;;  %s598_s1 = inlined_call_operand.vmem [shape: f32[1,72], index: 1, kind: input, shape index: {}]   ;;  %s599_s2 = inlined_call_operand.<no memory space> [shape: f32[1,1], index: 2, kind: input, shape index: {}]   ;;  %s600_s3 = inlined_call_operand.vmem [shape: f32[1,512], index: 3, kind: output, shape index: {}]  }
   0x1   :  { %v8_v0 = vstv %s599_s2 }
   0x2   :  { %9 = vst [vmem:[#allocation2] sm:$0x1] %v8_v0 }
   0x3   :  { %s502_s14 = smov 0   ;;  %s504_s15 = smov 0  }
   0x4   :  { %s506_s16 = smov 0  }
   0x5 LB: > { %s410_s2 = sadd.s32 4294967295, %s474_s16   ;;  %s519_s17 = sadd.s32 1, %s474_s16   ;;  %s474_s16 = sphi %s506_s16, %s603_s16   ;;  %s470_s15 = sphi %s504_s15, %s602_s15   ;;  %s466_s14 = sphi %s502_s14, %s601_s14  }
   0x6   : > { %s19_s18 = ssub.s32 %s474_s16, %s519_s17  ;;  %s22_s19 = sadd.s32 1, %s470_s15 }
   0x7   : > { %p20_p0 = scmp.eq.s32.totalorder %s19_s18, 0  ;;  %p29_p1 = scmp.ne.s32.totalorder %s470_s15, %s466_s14 }
   0x8   : > { %p30_p2 = scmp.eq.s32.totalorder %s474_s16, 0  ;;  %p413_p4 = scmp.ge.s32.totalorder %s474_s16, 2 }
   0x9   : > { %s528_s20 = scalar_select %p20_p0, %s470_s15, %s22_s19  }
   0xa   : > { %p31_p3 = por %p30_p2, %p29_p1  ;;  %129 = sbr.rel (%p413_p4) target bundleno = 28 (0x1c), region = 24 }
   0xf   : > { %132 = sbr.rel (!%p31_p3) target bundleno = 28 (0x1c), region = 28  ;;  %s134_s21 = sand.u32 (%p31_p3), 1, %s470_s15  }
  0x10   : > { %s421_s22 = sshll.u32 (%p31_p3), %s474_s16, 4  ;;  %s422_s23 = smul.u32 (%p31_p3), 144, %s134_s21 }
  0x11   : > { %s536_s26 = scalar_lea.vmem (%p31_p3), %s597_s0, %s421_s22 }
  0x12   : > { %v152_v1 = vld [vmem:[%s536_s26] sm:$0xff] (%p31_p3)  ;;  %v154_v2 = vld [vmem:[%s536_s26 + $0x8] sm:$0xff] (%p31_p3)  ;;  %s136_s27 = scalar_lea.vmem (%p31_p3), [#allocation3], %s422_s23 }
  0x13   : > { %v156_v3 = vld [vmem:[%s536_s26 + $0x20] sm:$0xff] (%p31_p3)  ;;  %v158_v4 = vld [vmem:[%s536_s26 + $0x28] sm:$0xff] (%p31_p3)  ;;  %153 = vst [vmem:[%s136_s27] sm:$0xff] (%p31_p3), %v152_v1  ;;  %155 = vst [vmem:[%s136_s27 + $0x8] sm:$0xff] (%p31_p3), %v154_v2 }
  0x14   : > { %v160_v5 = vld [vmem:[%s536_s26 + $0x40] sm:$0xff]  ;;  %v162_v6 = vld [vmem:[%s536_s26 + $0x48] sm:$0xff]  ;;  %157 = vst [vmem:[%s136_s27 + $0x10] sm:$0xff] %v156_v3  ;;  %159 = vst [vmem:[%s136_s27 + $0x18] sm:$0xff] %v158_v4 }
  0x15   : > { %161 = vst [vmem:[%s136_s27 + $0x20] sm:$0xff] %v160_v5  ;;  %163 = vst [vmem:[%s136_s27 + $0x28] sm:$0xff] %v162_v6  ;;  %v164_v7 = vld [vmem:[%s536_s26 + $0x60] sm:$0xff]  ;;  %v166_v8 = vld [vmem:[%s536_s26 + $0x68] sm:$0xff] }
  0x16   : > { %v168_v9 = vld [vmem:[%s536_s26 + $0x80] sm:$0xff]  ;;  %165 = vst [vmem:[%s136_s27 + $0x30] sm:$0xff] %v164_v7  ;;  %167 = vst [vmem:[%s136_s27 + $0x38] sm:$0xff] %v166_v8  ;;  %v170_v10 = vld [vmem:[%s536_s26 + $0x88] sm:$0xff] }
  0x17   : > { %169 = vst [vmem:[%s136_s27 + $0x40] sm:$0xff] %v168_v9  ;;  %v172_v11 = vld [vmem:[%s536_s26 + $0xa0] sm:$0xff]  ;;  %v174_v12 = vld [vmem:[%s536_s26 + $0xa8] sm:$0xff]  ;;  %171 = vst [vmem:[%s136_s27 + $0x48] sm:$0xff] %v170_v10 }
  0x18   : > { %173 = vst [vmem:[%s136_s27 + $0x50] sm:$0xff] %v172_v11  ;;  %175 = vst [vmem:[%s136_s27 + $0x58] sm:$0xff] %v174_v12  ;;  %v176_v13 = vld [vmem:[%s536_s26 + $0xc0] sm:$0xff]  ;;  %v178_v14 = vld [vmem:[%s536_s26 + $0xc8] sm:$0xff] }
  0x19   : > { %v180_v15 = vld [vmem:[%s536_s26 + $0xe0] sm:$0xff]  ;;  %177 = vst [vmem:[%s136_s27 + $0x60] sm:$0xff] %v176_v13  ;;  %179 = vst [vmem:[%s136_s27 + $0x68] sm:$0xff] %v178_v14  ;;  %v182_v16 = vld [vmem:[%s536_s26 + $0xe8] sm:$0xff] }
  0x1a   : > { %181 = vst [vmem:[%s136_s27 + $0x70] sm:$0xff] %v180_v15  ;;  %v184_v17 = vld [vmem:[%s536_s26 + $0x100] sm:$0xff]  ;;  %v186_v18 = vld [vmem:[%s536_s26 + $0x108] sm:$0xff]  ;;  %183 = vst [vmem:[%s136_s27 + $0x78] sm:$0xff] %v182_v16 }
  0x1b   : > { %185 = vst [vmem:[%s136_s27 + $0x80] sm:$0xff] %v184_v17  ;;  %187 = vst [vmem:[%s136_s27 + $0x88] sm:$0xff] %v186_v18 }
  0x1c PF: > { %p416_p5 = scmp.ge.s32.totalorder %s474_s16, 1  ;;  %p192_p6 = scmp.lt.s32.totalorder %s474_s16, 3 }
  0x1e   : > { %p193_p7 = pnand %p416_p5, %p192_p6 }
  0x1f   : > { %s199_s28 = sand.u32 (!%p193_p7), 1, %s466_s14   ;;  %s417_s6 = sshll.u32 (!%p193_p7), %s410_s2, 1 }
  0x20   : > { %196 = sbr.rel (%p193_p7) target bundleno = 261 (0x105), region = 51  ;;  %p223_p8 = scmp.lt.s32.totalorder (!%p193_p7), %s417_s6, 3 }
  0x21   : > { %s423_s29 = smul.u32 (!%p193_p7), 144, %s199_s28 }
  0x23   : > { %s559_s30 = scalar_lea.vmem (!%p193_p7), [#allocation3], %s423_s29 }
  0x25   : > { %v476_v19 = vmov 0.0   ;;  %v477_v20 = vmov 0   ;;  %v246_v21 = vld [vmem:[#allocation2] sm:$0x1]  ;;  %v243_v23 = vld [vmem:[%s559_s30 + $0x80] sm:$0xff]  ;;  %v241_v25 = vld [vmem:[%s559_s30 + $0x70] sm:$0xff]  ;;  %v252_v41 = vlaneseq }
  0x26   : > { %324 = vmatprep.mubr.f32.mxu0 %v476_v19  ;;  %451 = vset.pattern.permute.xlu0 %v477_v20  ;;  %v244_v22 = vld [vmem:[%s559_s30 + $0x88] sm:$0xff]  ;;  %v242_v24 = vld [vmem:[%s559_s30 + $0x78] sm:$0xff]  ;;  %v239_v27 = vld [vmem:[%s559_s30 + $0x60] sm:$0xff]  ;;  %vm256_vm0 = vcmask 588800   ;;  %v478_v44 = vmov 1966171168  }
  0x27   : > { %249 = vperm.xlu0 %451, %v246_v21   ;;  %274 = vmatprep.subr.mxu0 %v244_v22  ;;  %v240_v26 = vld [vmem:[%s559_s30 + $0x68] sm:$0xff]  ;;  %v238_v28 = vld [vmem:[%s559_s30 + $0x58] sm:$0xff]  ;;  %v237_v29 = vld [vmem:[%s559_s30 + $0x50] sm:$0xff]  ;;  %v253_v42 = vshrl.u32 %v252_v41, 7  ;;  %v335_v45 = vunpack.c.l.s4 %v478_v44  ;;  %s605_s6 = smov (!%p223_p8, %s417_s6), 3  ;;  %vm351_vm1 = vcmp.lt.s32.totalorder %v252_v41, 256 }
  0x28   : > { %275 = vmatpush1.msra.mxu0 %v243_v23  ;;  %v236_v30 = vld [vmem:[%s559_s30 + $0x48] sm:$0xff]  ;;  %v235_v31 = vld [vmem:[%s559_s30 + $0x40] sm:$0xff]  ;;  %v234_v32 = vld [vmem:[%s559_s30 + $0x38] sm:$0xff]  ;;  %s225_s9 = scalar_lea.vmem %s600_s3, %s605_s6 }
  0x29   : > { %276 = vmatprep.subr.mxu0 %v242_v24  ;;  %v233_v33 = vld [vmem:[%s559_s30 + $0x30] sm:$0xff]  ;;  %v232_v34 = vld [vmem:[%s559_s30 + $0x28] sm:$0xff]  ;;  %v231_v35 = vld [vmem:[%s559_s30 + $0x20] sm:$0xff]  ;;  %v254_v43 = vsub.s32 0, %v253_v42  ;;  %v336_v48 = vunpack.c.0.s8 %v335_v45 }
  0x2a   : > { %277 = vmatpush1.msra.mxu0 %v241_v25  ;;  %v230_v36 = vld [vmem:[%s559_s30 + $0x18] sm:$0xff]  ;;  %v229_v37 = vld [vmem:[%s559_s30 + $0x10] sm:$0xff]  ;;  %v228_v38 = vld [vmem:[%s559_s30 + $0x8] sm:$0xff] }
  0x2b   : > { %278 = vmatprep.subr.mxu0 %v240_v26  ;;  %v227_v39 = vld [vmem:[%s559_s30] sm:$0xff]  ;;  %v245_v40 = vld [vmem:[%s598_s1] sm:$0x1]  ;;  %v339_v53 = vsub.s32 %v336_v48, %v253_v42 }
  0x2c   : > { %279 = vmatpush1.msra.mxu0 %v239_v27 }
  0x2d   : > { %280 = vmatprep.subr.mxu0 %v238_v28 }
  0x2e   : > { %281 = vmatpush1.msra.mxu0 %v237_v29 }
  0x2f   : > { %282 = vmatprep.subr.mxu0 %v236_v30 }
  0x30   : > { %283 = vmatpush1.msra.mxu0 %v235_v31 }
  0x31   : > { %284 = vmatprep.subr.mxu0 %v234_v32 }
  0x32   : > { %285 = vmatpush1.msra.mxu0 %v233_v33 }
  0x33   : > { %286 = vmatprep.subr.mxu0 %v232_v34 }
  0x34   : > { %287 = vmatpush1.msra.mxu0 %v231_v35 }
  0x35   : > { %288 = vmatprep.subr.mxu0 %v230_v36 }
  0x36   : > { %289 = vmatpush1.msra.mxu0 %v229_v37 }
  0x37   : > { %290 = vmatprep.subr.mxu0 %v228_v38 }
  0x38   : > { %291 = vmatpush1.msra.mxu0 %v227_v39 }
  0x39   : > { %418 = vmatmul.mubr.msk.f32.vlgmr.msra.gmra.mxu0 %vm256_vm0, %v245_v40 }
  0xa2   : > { %v250_v46 = vpop.permute.xlu0 %249 }
  0xa3   : > { %v255_v47 = vrot.slane %v250_v46, %v254_v43 }
  0xf9   : > { %v326_v49 = vpop.f32.mrf.mxu0 }
  0xfa   : > { %v327_v51 = vadd.f32 %v326_v49, %v255_v47 }
  0xfb   : > { %v328_v50 = vpop.f32.mrf.mxu0 }
  0xfc   : > { %v329_v52 = vadd.f32 %v328_v50, %v255_v47 }
  0xfe   : > { %v333_v54 = vcombine.low %v327_v51, %v329_v52 }
 0x100   : > { %v340_v55 = vrot.slane %v333_v54, %v339_v53 }
 0x102   : > { %v347_v56 = vrot.slane %v340_v55, %v339_v53 }
 0x104   : > { %353 = vst.msk [vmem:[%s225_s9] sm:$0x3] %vm351_vm1, %v347_v56 }
 0x105 PF: > { %p12_p9 = scmp.ge.s32.totalorder %s519_s17, 4   ;;  %s601_s14 = smov %s470_s15 }
 0x106   : > { %s602_s15 = smov %s528_s20  ;;  %s603_s16 = smov %s519_s17 }
 0x107   :  { %14 = sbr.rel (!%p12_p9) target bundleno = 5 (0x5), region = 90 }

// kernel: denoiser_forward.13
= control target key start
LH: loop header
LB: loop body
LE: loop exit
PB: predicated region body
PF: predicated region fallthrough
CT: control target
= control target key end

     0   :  { %s530_s0 = inlined_call_operand.vmem [shape: f32[9,512], index: 0, kind: input, shape index: {}]   ;;  %s531_s1 = inlined_call_operand.vmem [shape: f32[1,9], index: 1, kind: input, shape index: {}]   ;;  %s532_s2 = inlined_call_operand.<no memory space> [shape: f32[1,1], index: 2, kind: input, shape index: {}]   ;;  %s533_s3 = inlined_call_operand.vmem [shape: f32[1,512], index: 3, kind: output, shape index: {}]  }
   0x1   :  { %v8_v0 = vstv %s532_s2 }
   0x2   :  { %9 = vst [vmem:[#allocation2] sm:$0x1] %v8_v0 }
   0x3   :  { %s475_s14 = smov 0   ;;  %s477_s15 = smov 0  }
   0x4   :  { %s479_s16 = smov 0  }
   0x5 LB: > { %s377_s2 = sadd.s32 4294967295, %s447_s16   ;;  %s492_s17 = sadd.s32 1, %s447_s16   ;;  %s447_s16 = sphi %s479_s16, %s536_s16   ;;  %s443_s15 = sphi %s477_s15, %s535_s15   ;;  %s439_s14 = sphi %s475_s14, %s534_s14  }
   0x6   : > { %s19_s18 = ssub.s32 %s447_s16, %s492_s17  ;;  %s22_s19 = sadd.s32 1, %s443_s15 }
   0x7   : > { %p20_p0 = scmp.eq.s32.totalorder %s19_s18, 0  ;;  %p29_p1 = scmp.ne.s32.totalorder %s443_s15, %s439_s14 }
   0x8   : > { %p30_p2 = scmp.eq.s32.totalorder %s447_s16, 0  ;;  %p380_p4 = scmp.ge.s32.totalorder %s447_s16, 2 }
   0x9   : > { %s501_s20 = scalar_select %p20_p0, %s443_s15, %s22_s19  }
   0xa   : > { %p31_p3 = por %p30_p2, %p29_p1  ;;  %129 = sbr.rel (%p380_p4) target bundleno = 21 (0x15), region = 24 }
   0xf   : > { %132 = sbr.rel (!%p31_p3) target bundleno = 21 (0x15), region = 28  ;;  %s134_s21 = sand.u32 (%p31_p3), 1, %s443_s15  }
  0x10   : > { %s392_s22 = sshll.u32 (%p31_p3), %s447_s16, 4  ;;  %s381_s23 = sshll.u32 (%p31_p3), %s134_s21, 5 }
  0x11   : > { %s139_s26 = scalar_lea.vmem (%p31_p3), %s530_s0, %s392_s22  ;;  %s136_s27 = scalar_lea.vmem (%p31_p3), [#allocation3], %s381_s23 }
  0x12   : > { %v152_v1 = vld [vmem:[%s139_s26] sm:$0xff] (%p31_p3)  ;;  %v154_v2 = vld [vmem:[%s139_s26 + $0x8] sm:$0xff] (%p31_p3) }
  0x13   : > { %v156_v3 = vld [vmem:[%s139_s26 + $0x20] sm:$0xff] (%p31_p3)  ;;  %153 = vst [vmem:[%s136_s27] sm:$0xff] (%p31_p3), %v152_v1  ;;  %155 = vst [vmem:[%s136_s27 + $0x8] sm:$0xff] (%p31_p3), %v154_v2  ;;  %v158_v4 = vld [vmem:[%s139_s26 + $0x28] sm:$0xff] (%p31_p3) }
  0x14   : > { %157 = vst [vmem:[%s136_s27 + $0x10] sm:$0xff] %v156_v3  ;;  %159 = vst [vmem:[%s136_s27 + $0x18] sm:$0xff] %v158_v4 }
  0x15 PF: > { %p384_p5 = scmp.ge.s32.totalorder %s447_s16, 1  ;;  %p164_p6 = scmp.lt.s32.totalorder %s447_s16, 3 }
  0x17   : > { %p165_p7 = pnand %p384_p5, %p164_p6 }
  0x18   : > { %s171_s28 = sand.u32 (!%p165_p7), 1, %s439_s14   ;;  %s386_s6 = sshll.u32 (!%p165_p7), %s377_s2, 1 }
  0x19   : > { %168 = sbr.rel (%p165_p7) target bundleno = 254 (0xfe), region = 51  ;;  %s385_s29 = sshll.u32 (!%p165_p7), %s171_s28, 5 }
  0x1a   : > { %s173_s30 = scalar_lea.vmem (!%p165_p7), [#allocation3], %s385_s29  ;;  %p195_p8 = scmp.lt.s32.totalorder (!%p165_p7), %s386_s6, 3 }
  0x1e   : > { %vm218_vm0 = vcmask 1040384   ;;  %v449_v5 = vmov 0.0   ;;  %v204_v6 = vld [vmem:[#allocation2] sm:$0x1]  ;;  %v450_v7 = vmov 0   ;;  %v200_v10 = vld [vmem:[%s173_s30 + $0x8] sm:$0xff]  ;;  %v210_v13 = vlaneseq }
  0x1f   : > { %289 = vmatprep.mubr.f32.mxu0 %v449_v5  ;;  %420 = vset.pattern.permute.xlu0 %v450_v7  ;;  %v202_v8 = vld [vmem:[%s173_s30 + $0x18] sm:$0x1]  ;;  %v201_v9 = vld [vmem:[%s173_s30 + $0x10] sm:$0x1]  ;;  %v199_v11 = vld [vmem:[%s173_s30] sm:$0xff]  ;;  %vm214_vm1 = vcmask 72704  }
  0x20   : > { %207 = vperm.xlu0 %420, %v204_v6   ;;  %387 = vmatprep.subr.msk.mxu0 %vm218_vm0, %v202_v8  ;;  %v203_v12 = vld [vmem:[%s531_s1] sm:$0x1]  ;;  %v211_v14 = vshrl.u32 %v210_v13, 7  ;;  %v451_v22 = vmov 1966171168   ;;  %s538_s6 = smov (!%p195_p8, %s386_s6), 3 }
  0x21   : > { %388 = vmatpush1.msk.msra.mxu0 %vm218_vm0, %v201_v9  ;;  %v302_v23 = vunpack.c.l.s4 %v451_v22  ;;  %vm318_vm2 = vcmp.lt.s32.totalorder %v210_v13, 256  ;;  %s197_s9 = scalar_lea.vmem %s533_s3, %s538_s6 }
  0x22   : > { %255 = vmatprep.subr.mxu0 %v200_v10  ;;  %v212_v15 = vsub.s32 0, %v211_v14 }
  0x23   : > { %256 = vmatpush1.msra.mxu0 %v199_v11  ;;  %v303_v24 = vunpack.c.0.s8 %v302_v23 }
  0x24   : > { %389 = vmatmul.mubr.msk.f32.vlgmr.msra.gmra.mxu0 %vm214_vm1, %v203_v12 }
  0x25   : > { %v306_v26 = vsub.s32 %v303_v24, %v211_v14 }
  0x9b   : > { %v208_v16 = vpop.permute.xlu0 %207 }
  0x9c   : > { %v213_v17 = vrot.slane %v208_v16, %v212_v15 }
  0xe4   : > { %v291_v18 = vpop.f32.mrf.mxu0 }
  0xe5   : > { %v292_v19 = vadd.f32 %v291_v18, %v213_v17 }
  0xe6   : > { %v293_v20 = vpop.f32.mrf.mxu0 }
  0xe7   : > { %v294_v21 = vadd.f32 %v293_v20, %v213_v17  ;;  %421 = vtanh.f32 %v292_v19 }
  0xe9   : > { %423 = vtanh.f32 %v294_v21 }
  0xf4   : > { %v422_v25 = vpop.eup %421 }
  0xf6   : > { %v424_v27 = vpop.eup %423 }
  0xf7   : > { %v300_v28 = vcombine.low %v422_v25, %v424_v27 }
  0xf9   : > { %v307_v29 = vrot.slane %v300_v28, %v306_v26 }
  0xfb   : > { %v314_v30 = vrot.slane %v307_v29, %v306_v26 }
  0xfd   : > { %320 = vst.msk [vmem:[%s197_s9] sm:$0x3] %vm318_vm2, %v314_v30 }
  0xfe PF: > { %p12_p9 = scmp.ge.s32.totalorder %s492_s17, 4   ;;  %s534_s14 = smov %s443_s15 }
  0xff   : > { %s535_s15 = smov %s501_s20  ;;  %s536_s16 = smov %s492_s17 }
 0x100   :  { %14 = sbr.rel (!%p12_p9) target bundleno = 5 (0x5), region = 90 }

</bundles_post_ra>
